<compile_context>
chip_gen: v7x
topology: tpu7x:2x2x1
jax: 0.10.0
libtpu: 0.0.40
codegen_flags: <defaults>
</compile_context>

<pallas_src>
import functools

import jax
import jax.numpy as jnp
from jax.experimental import pallas as pl
from jax.experimental.pallas import tpu as pltpu

IN_FEATURES = 3072
OUT_FEATURES = 10
OUT_PAD = 128          # lane-dense width for the weight / MXU accumulator
TM_DEFAULT = 1024      # M-tile: 1024x3072 f32 = 12 MiB/tile, ~28 MiB peak VMEM


def linear_kernel(x_ref, w_ref, b_ref, o_ref):
    # x_ref: (tm, IN), w_ref: (IN, OUT_PAD), b_ref: (1, OUT_FEATURES), o_ref: (tm, OUT_FEATURES)
    acc = jnp.dot(x_ref[...], w_ref[...], preferred_element_type=jnp.float32)
    # Slice the lane-padded accumulator down to the real 10 columns and write narrow
    # (masked vst) — output volume is <1% of input, so this is free vs. the HBM read.
    o_ref[...] = (acc[:, :OUT_FEATURES] + b_ref[...]).astype(o_ref.dtype)


def prepare_params(w, b):
    """One-time parameter prep (do NOT call per forward): lane-pad W, reshape b to 2D."""
    w_pad = jnp.zeros((IN_FEATURES, OUT_PAD), w.dtype).at[:, :OUT_FEATURES].set(w)
    b2d = b.reshape(1, OUT_FEATURES)
    return w_pad, b2d


def _choose_tm(B, tm_max):
    """Pick the M-tile size.

    - Tiny batches: one tile covering the whole batch (block dim == array dim is legal).
    - Moderate batches (B <= 2*tm_max): split into >=2 grid steps so the parallel grid
      axis can be sharded across both TensorCores on v7x (no-op cost on v5e/v6e).
    - Large batches: fixed tm_max (multiple of 8), edge tile clamped automatically.
    """
    if B <= 8:
        return B
    if B <= 2 * tm_max:
        half = -(-B // 2)                    # cdiv(B, 2)
        return min(-(-half // 8) * 8, tm_max)  # round up to a multiple of 8
    return tm_max


@functools.partial(jax.jit, static_argnames=("tm_max",))
def jl_net_forward(x, w_pad, b2d, *, tm_max=TM_DEFAULT):
    """x: [B, 3072] f32, w_pad: [3072, 128] f32, b2d: [1, 10] f32 -> [B, 10] f32."""
    B = x.shape[0]
    tm = _choose_tm(B, tm_max)
    grid = (pl.cdiv(B, tm),)

    return pl.pallas_call(
        linear_kernel,
        out_shape=jax.ShapeDtypeStruct((B, OUT_FEATURES), x.dtype),
        grid_spec=pl.GridSpec(
            grid=grid,
            in_specs=[
                # x streams in M-tiles (auto double-buffered / pipelined).
                pl.BlockSpec((tm, IN_FEATURES), lambda i: (i, 0)),
                # weight and bias stay VMEM-resident (same block every step).
                pl.BlockSpec((IN_FEATURES, OUT_PAD), lambda i: (0, 0)),
                pl.BlockSpec((1, OUT_FEATURES), lambda i: (0, 0)),
            ],
            # Narrow (10-wide) output written directly — no padded round trip / XLA slice.
            out_specs=pl.BlockSpec((tm, OUT_FEATURES), lambda i: (i, 0)),
        ),
        compiler_params=pltpu.CompilerParams(
            # M-tiles are independent -> shard across TensorCores (v7x megacore).
            dimension_semantics=("parallel",),
            # ~28 MiB peak at tm=1024; 48 MiB fits v5e/v6e (128 MiB) and v7x (64 MiB)
            # with headroom for Mosaic internal scratch. Do NOT raise tm on v7x.
            vmem_limit_bytes=48 << 20,
        ),
        cost_estimate=pl.CostEstimate(
            flops=2 * B * IN_FEATURES * OUT_PAD,
            transcendentals=0,
            bytes_accessed=(B * IN_FEATURES + IN_FEATURES * OUT_PAD
                            + OUT_FEATURES + B * OUT_FEATURES) * 4,
        ),
    )(x, w_pad, b2d)


def init_params(key):
    # Deterministic init mimicking nn.Linear default: U(-1/sqrt(in), 1/sqrt(in)).
    kw, kb = jax.random.split(key)
    bound = 1.0 / (IN_FEATURES ** 0.5)
    w = jax.random.uniform(
        kw, (IN_FEATURES, OUT_FEATURES), jnp.float32, minval=-bound, maxval=bound
    )
    b = jax.random.uniform(
        kb, (OUT_FEATURES,), jnp.float32, minval=-bound, maxval=bound
    )
    return w, b


if __name__ == "__main__":
    key = jax.random.PRNGKey(0)
    kx, kp = jax.random.split(key)

    w, b = init_params(kp)
    w_pad, b2d = prepare_params(w, b)   # hoisted out of the forward path (done once)

    # Small batch (single-tile path).
    batch = 2
    x = jax.random.normal(kx, (batch, IN_FEATURES), dtype=jnp.float32)
    out = jax.block_until_ready(jl_net_forward(x, w_pad, b2d))
    ref = x @ w + b
    assert out.shape == (batch, OUT_FEATURES)
    assert jnp.allclose(out, ref, atol=1e-4, rtol=1e-4)

    # Moderate batch (multi-step grid path, non-multiple-of-tile edge block).
    x2 = jax.random.normal(jax.random.PRNGKey(1), (24, IN_FEATURES), dtype=jnp.float32)
    out2 = jax.block_until_ready(jl_net_forward(x2, w_pad, b2d))
    ref2 = x2 @ w + b
    assert out2.shape == (24, OUT_FEATURES)
    assert jnp.allclose(out2, ref2, atol=1e-4, rtol=1e-4)

    print("KERNEL_OK")
</pallas_src>

<mosaic_0001>
module attributes {stable_mosaic.version = 11 : i64} {
  func.func @linear_kernel(%arg0: i32, %arg1: memref<2x3072xf32, #tpu.memory_space<vmem>>, %arg2: memref<3072x128xf32, #tpu.memory_space<vmem>>, %arg3: memref<1x10xf32, #tpu.memory_space<vmem>>, %arg4: memref<2x10xf32, #tpu.memory_space<vmem>>) attributes {dimension_semantics = [#tpu.dimension_semantics<parallel>], iteration_bounds = array<i64: 1>, scalar_prefetch = 0 : i64, scratch_operands = 0 : i64, tpu.core_type = #tpu.core_type<tc>, window_params = [{transform_indices = @transform_0, window_bounds = array<i64: 2, 3072>}, {pipeline_mode = #tpu.pipeline_mode<synchronous>, transform_indices = @transform_1, window_bounds = array<i64: 3072, 128>}, {pipeline_mode = #tpu.pipeline_mode<synchronous>, transform_indices = @transform_2, window_bounds = array<i64: 1, 10>}, {transform_indices = @transform_3, window_bounds = array<i64: 2, 10>}]} {
    %c0 = arith.constant 0 : index
    %c0_0 = arith.constant 0 : index
    %0 = vector.load %arg1[%c0, %c0_0] : memref<2x3072xf32, #tpu.memory_space<vmem>>, vector<2x3072xf32>
    %c0_1 = arith.constant 0 : index
    %c0_2 = arith.constant 0 : index
    %1 = vector.load %arg2[%c0_1, %c0_2] : memref<3072x128xf32, #tpu.memory_space<vmem>>, vector<3072x128xf32>
    %cst = arith.constant dense<0.000000e+00> : vector<2x128xf32>
    %2 = tpu.matmul %0, %1, %cst {dimension_numbers = #tpu.dot_dimension_numbers<[1], [0], [0], [1], [0, 0, 1, 1], [], []>} : vector<2x3072xf32>, vector<3072x128xf32>, vector<2x128xf32> -> vector<2x128xf32>
    %3 = vector.extract_strided_slice %2 {offsets = [0, 0], sizes = [2, 10], strides = [1, 1]} : vector<2x128xf32> to vector<2x10xf32>
    %c0_3 = arith.constant 0 : index
    %c0_4 = arith.constant 0 : index
    %4 = vector.load %arg3[%c0_3, %c0_4] : memref<1x10xf32, #tpu.memory_space<vmem>>, vector<1x10xf32>
    %5 = vector.broadcast %4 : vector<1x10xf32> to vector<2x10xf32>
    %6 = arith.addf %3, %5 : vector<2x10xf32>
    %c0_5 = arith.constant 0 : index
    %c0_6 = arith.constant 0 : index
    %7 = vector.load %arg4[%c0_5, %c0_6] : memref<2x10xf32, #tpu.memory_space<vmem>>, vector<2x10xf32>
    tpu.vector_store %arg4[%c0_5, %c0_6], %6 {strides = array<i32>} : memref<2x10xf32, #tpu.memory_space<vmem>>, vector<2x10xf32>,
    return
  }
  func.func @transform_0(%arg0: i32) -> (i32, i32) {
    %c0_i32 = arith.constant 0 : i32
    %c0_i32_0 = arith.constant 0 : i32
    return %arg0, %c0_i32 : i32, i32
  }
  func.func @transform_1(%arg0: i32) -> (i32, i32) {
    %c0_i32 = arith.constant 0 : i32
    %c0_i32_0 = arith.constant 0 : i32
    %c0_i32_1 = arith.constant 0 : i32
    return %c0_i32, %c0_i32_0 : i32, i32
  }
  func.func @transform_2(%arg0: i32) -> (i32, i32) {
    %c0_i32 = arith.constant 0 : i32
    %c0_i32_0 = arith.constant 0 : i32
    %c0_i32_1 = arith.constant 0 : i32
    return %c0_i32, %c0_i32_0 : i32, i32
  }
  func.func @transform_3(%arg0: i32) -> (i32, i32) {
    %c0_i32 = arith.constant 0 : i32
    %c0_i32_0 = arith.constant 0 : i32
    return %arg0, %c0_i32 : i32, i32
  }
}

</mosaic_0001>

<bundles_post_ra>
// kernel: jl_net_forward.1
= control target key start
LH: loop header
LB: loop body
LE: loop exit
PB: predicated region body
PF: predicated region fallthrough
CT: control target
= control target key end

     0   :  { %8 = vsyncpa [#allocation3], 0  ;;  %s2491_s0 = inlined_call_operand.hbm [shape: f32[2,3072], index: 0, kind: input, shape index: {}]   ;;  %s2492_s1 = inlined_call_operand.hbm [shape: f32[3072,128], index: 1, kind: input, shape index: {}]   ;;  %s2493_s2 = inlined_call_operand.hbm [shape: f32[1,10], index: 2, kind: input, shape index: {}]   ;;  %s2494_s3 = inlined_call_operand.hbm [shape: f32[2,10], index: 3, kind: output, shape index: {}]  }
   0x1   :  { %9 = vsyncpa [#allocation6], 0 }
   0x2   :  { %10 = vsyncpa [#allocation4], 0  ;;  %s2352_s12 = smov [#allocation5]   ;;  %s2258_s16 = scalar_lea.hbm %s2492_s1, 49152 }
   0x3   :  { %s26_s13 = sshll.u32 %s2352_s12, 4  ;;  %p2259_p0 = scmp.ne.s32.totalorder %s2492_s1, %s2258_s16  ;;  %s27_s13 = int_to_ptr.vmem [resolvable:$true] %s26_s13 }
   0x4   :  { %p2262_p1 = scmp.lt.u32.totalorder %s2258_s16, %s2492_s1 }
   0x6   :  { %p2264_p2 = pnand %p2262_p1, %p2259_p0 }
   0x8   :  { %2267 = shalt.err (!%p2264_p2)
}
   0x9   :  { %s2268_s21 = scalar_lea.vmem %s27_s13, 49152  ;;  %p2273_p4 = scmp.lt.s32.totalorder %s27_s13, %s27_s13 }
   0xa   :  { %p2269_p3 = scmp.ne.s32.totalorder %s27_s13, %s2268_s21  ;;  %p2274_p5 = scmp.lt.s32.totalorder %s2268_s21, %s2268_s21 }
   0xc   :  { %p2275_p6 = por %p2274_p5, %p2273_p4 }
   0xe   :  { %p2276_p7 = pnand %p2275_p6, %p2269_p3 }
  0x10   :  { %2279 = shalt.err (!%p2276_p7)
}
  0x11   :  { %s2353_s22 = smov 128   ;;  %s2354_s23 = smov 8  }
  0x12   :  { %32 = dma.hbm_to_vmem [thread:$0]  %s2492_s1, 49152, %s27_s13, [#allocation6], %s2353_s22, %s2353_s22, %s2354_s23  }
  0x13   :  { %s2355_s26 = smov [#allocation2]   ;;  %s2356_s28 = smov [#allocation7]  }
  0x14   :  { %s17_s27 = sshll.u32 %s2355_s26, 4  ;;  %s39_s29 = sshll.u32 %s2356_s28, 4  ;;  %s18_s27 = int_to_ptr.vmem [resolvable:$true] %s17_s27  ;;  %s40_s29 = int_to_ptr.vmem [resolvable:$true] %s39_s29 }
  0x15   :  { %s2280_s5 = scalar_lea.hbm %s2491_s0, 768 }
  0x16   :  { %p2281_p8 = scmp.ne.s32.totalorder %s2491_s0, %s2280_s5  ;;  %p2284_p9 = scmp.lt.u32.totalorder %s2280_s5, %s2491_s0 }
  0x18   :  { %p2286_p10 = pnand %p2284_p9, %p2281_p8 }
  0x1a   :  { %2289 = shalt.err (!%p2286_p10)
}
  0x1b   :  { %s2290_s1 = scalar_lea.vmem %s18_s27, 768  ;;  %p2295_p12 = scmp.lt.s32.totalorder %s18_s27, %s18_s27 }
  0x1c   :  { %p2291_p11 = scmp.ne.s32.totalorder %s18_s27, %s2290_s1  ;;  %p2296_p13 = scmp.lt.s32.totalorder %s2290_s1, %s2290_s1 }
  0x1e   :  { %p2297_p0 = por %p2296_p13, %p2295_p12 }
  0x20   :  { %p2298_p1 = pnand %p2297_p0, %p2291_p11 }
  0x22   :  { %2301 = shalt.err (!%p2298_p1)
}
  0x23   :  { %20 = dma.hbm_to_vmem [thread:$0]  %s2491_s0, 768, %s18_s27, [#allocation3]  }
  0x24   :  { %s2302_s14 = scalar_lea.hbm %s2493_s2, 16 }
  0x25   :  { %p2303_p2 = scmp.ne.s32.totalorder %s2493_s2, %s2302_s14  ;;  %p2306_p3 = scmp.lt.u32.totalorder %s2302_s14, %s2493_s2 }
  0x27   :  { %p2308_p4 = pnand %p2306_p3, %p2303_p2 }
  0x29   :  { %2311 = shalt.err (!%p2308_p4)
}
  0x2a   :  { %s2312_s19 = scalar_lea.vmem %s40_s29, 16  ;;  %s2316_s20 = scalar_lea.vmem %s40_s29, 32 }
  0x2b   :  { %p2313_p5 = scmp.ne.s32.totalorder %s40_s29, %s2312_s19  ;;  %p2317_p6 = scmp.lt.s32.totalorder %s40_s29, %s40_s29 }
  0x2c   :  { %p2318_p7 = scmp.lt.s32.totalorder %s2316_s20, %s2312_s19 }
  0x2e   :  { %p2319_p8 = por %p2318_p7, %p2317_p6 }
  0x30   :  { %p2320_p9 = pnand %p2319_p8, %p2313_p5 }
  0x32   :  { %2323 = shalt.err (!%p2320_p9)
}
  0x33   :  { %42 = dma.hbm_to_vmem [thread:$0]  %s2493_s2, 16, %s40_s29, [#allocation6]  }
  0x34   :  { %2346 = dma.done.wait [#allocation3], 768  }
  0x35   :  { %2347 = vsyncadd [#allocation3], 4294966528 }
  0x36   :  { %2348 = dma.done.wait [#allocation6], 49168  }
  0x37   :  { %2349 = vsyncadd [#allocation6], 4294918128  ;;  %v74_v0 = vld [vmem:[#allocation5 + $0x80] sm:$0xff]  ;;  %v75_v1 = vld [vmem:[#allocation5 + $0x88] sm:$0xff]  ;;  %v2357_v47 = vmov 1983009808   ;;  %v452_v49 = vlaneseq }
  0x38   :  { %v106_v2 = vld [vmem:[#allocation5 + $0x180] sm:$0xff]  ;;  %v1861_v3 = vpack.c.bf16 %v75_v1, %v74_v0  ;;  %v107_v4 = vld [vmem:[#allocation5 + $0x188] sm:$0xff]  ;;  %v76_v11 = vld [vmem:[#allocation5 + $0x90] sm:$0xff]  ;;  %v450_v48 = vunpack.c.l.s4 %v2357_v47  ;;  %s2358_s2 = smov [#allocation8]   ;;  %vm1422_vm0 = vcmask 74752  }
  0x39   :  { %v58_v5 = vld [vmem:[#allocation5] sm:$0xff]  ;;  %v59_v6 = vld [vmem:[#allocation5 + $0x8] sm:$0xff]  ;;  %v1893_v7 = vpack.c.bf16 %v107_v4, %v106_v2  ;;  %v77_v13 = vld [vmem:[#allocation5 + $0x98] sm:$0xff]  ;;  %v453_v0 = vshrl.u32 %v452_v49, 7  ;;  %s1430_s22 = sshll.u32 %s2358_s2, 4  ;;  %s1431_s22 = int_to_ptr.vmem [resolvable:$true] %s1430_s22 }
  0x3a   :  { %v1863_v8 = vpack.c.bf16 %v59_v6, %v58_v5  ;;  %v90_v9 = vld [vmem:[#allocation5 + $0x100] sm:$0xff]  ;;  %v91_v10 = vld [vmem:[#allocation5 + $0x108] sm:$0xff]  ;;  %1862 = vmatprep.subr.bf16.mxu0 %v1861_v3  ;;  %v108_v14 = vld [vmem:[#allocation5 + $0x190] sm:$0xff]  ;;  %v1865_v16 = vpack.c.bf16 %v77_v13, %v76_v11  ;;  %v451_v63 = vunpack.c.0.s8 %v450_v48  ;;  %s2324_s23 = scalar_lea.vmem %s1431_s22, 32  ;;  %p2329_p11 = scmp.lt.s32.totalorder %s1431_s22, %s1431_s22 }
  0x3b   :  { %v1895_v12 = vpack.c.bf16 %v91_v10, %v90_v9  ;;  %v109_v15 = vld [vmem:[#allocation5 + $0x198] sm:$0xff]  ;;  %1894 = vmatprep.subr.bf16.mxu1 %v1893_v7  ;;  %v60_v18 = vld [vmem:[#allocation5 + $0x10] sm:$0xff]  ;;  %v78_v23 = vld [vmem:[#allocation5 + $0xa0] sm:$0xff]  ;;  %p2325_p10 = scmp.ne.s32.totalorder %s1431_s22, %s2324_s23  ;;  %p2330_p12 = scmp.lt.s32.totalorder %s2324_s23, %s2324_s23 }
  0x3c   :  { %1864 = vmatpush3.bf16.msra.mxu0 %v1863_v8  ;;  %v1897_v17 = vpack.c.bf16 %v109_v15, %v108_v14  ;;  %v61_v19 = vld [vmem:[#allocation5 + $0x18] sm:$0xff]  ;;  %v92_v20 = vld [vmem:[#allocation5 + $0x110] sm:$0xff]  ;;  %v79_v24 = vld [vmem:[#allocation5 + $0xa8] sm:$0xff]  ;;  %v2415_v13 = vsub.s32 %v451_v63, %v453_v0 }
  0x3d   :  { %1896 = vmatpush3.bf16.msra.mxu1 %v1895_v12  ;;  %v1867_v21 = vpack.c.bf16 %v61_v19, %v60_v18  ;;  %v93_v22 = vld [vmem:[#allocation5 + $0x118] sm:$0xff]  ;;  %1866 = vmatprep.subr.bf16.mxu0 %v1865_v16  ;;  %v1869_v26 = vpack.c.bf16 %v79_v24, %v78_v23  ;;  %v110_v27 = vld [vmem:[#allocation5 + $0x1a0] sm:$0xff]  ;;  %v111_v28 = vld [vmem:[#allocation5 + $0x1a8] sm:$0xff]  ;;  %p2331_p13 = por %p2330_p12, %p2329_p11 }
  0x3e   :  { %1898 = vmatprep.subr.bf16.mxu1 %v1897_v17  ;;  %v1899_v25 = vpack.c.bf16 %v93_v22, %v92_v20  ;;  %v62_v29 = vld [vmem:[#allocation5 + $0x20] sm:$0xff]  ;;  %v1901_v30 = vpack.c.bf16 %v111_v28, %v110_v27  ;;  %v63_v31 = vld [vmem:[#allocation5 + $0x28] sm:$0xff]  ;;  %v80_v35 = vld [vmem:[#allocation5 + $0xb0] sm:$0xff] }
  0x3f   :  { %v94_v32 = vld [vmem:[#allocation5 + $0x120] sm:$0xff]  ;;  %v95_v33 = vld [vmem:[#allocation5 + $0x128] sm:$0xff]  ;;  %v1871_v34 = vpack.c.bf16 %v63_v31, %v62_v29  ;;  %v81_v36 = vld [vmem:[#allocation5 + $0xb8] sm:$0xff]  ;;  %p2332_p0 = pnand %p2331_p13, %p2325_p10 }
  0x40   :  { %1868 = vmatpush3.bf16.msra.mxu0 %v1867_v21  ;;  %v112_v37 = vld [vmem:[#allocation5 + $0x1b0] sm:$0xff]  ;;  %v1903_v38 = vpack.c.bf16 %v95_v33, %v94_v32  ;;  %v1873_v39 = vpack.c.bf16 %v81_v36, %v80_v35  ;;  %v113_v40 = vld [vmem:[#allocation5 + $0x1b8] sm:$0xff]  ;;  %v82_v46 = vld [vmem:[#allocation5 + $0xc0] sm:$0xff] }
  0x41   :  { %1900 = vmatpush3.bf16.msra.mxu1 %v1899_v25  ;;  %1870 = vmatprep.subr.bf16.mxu0 %v1869_v26  ;;  %v64_v41 = vld [vmem:[#allocation5 + $0x30] sm:$0xff]  ;;  %v65_v42 = vld [vmem:[#allocation5 + $0x38] sm:$0xff]  ;;  %v1905_v43 = vpack.c.bf16 %v113_v40, %v112_v37  ;;  %v83_v50 = vld [vmem:[#allocation5 + $0xc8] sm:$0xff] }
  0x42   :  { %1902 = vmatprep.subr.bf16.mxu1 %v1901_v30  ;;  %v96_v44 = vld [vmem:[#allocation5 + $0x130] sm:$0xff]  ;;  %v97_v45 = vld [vmem:[#allocation5 + $0x138] sm:$0xff]  ;;  %v114_v51 = vld [vmem:[#allocation5 + $0x1c0] sm:$0xff]  ;;  %v1875_v53 = vpack.c.bf16 %v65_v42, %v64_v41  ;;  %v1877_v55 = vpack.c.bf16 %v83_v50, %v82_v46 }
  0x43   :  { %v115_v52 = vld [vmem:[#allocation5 + $0x1c8] sm:$0xff]  ;;  %v1907_v54 = vpack.c.bf16 %v97_v45, %v96_v44  ;;  %v66_v56 = vld [vmem:[#allocation5 + $0x40] sm:$0xff]  ;;  %v84_v61 = vld [vmem:[#allocation5 + $0xd0] sm:$0xff] }
  0x44   :  { %1872 = vmatpush3.bf16.msra.mxu0 %v1871_v34  ;;  %v67_v57 = vld [vmem:[#allocation5 + $0x48] sm:$0xff]  ;;  %v98_v58 = vld [vmem:[#allocation5 + $0x140] sm:$0xff]  ;;  %v1909_v59 = vpack.c.bf16 %v115_v52, %v114_v51  ;;  %v85_v62 = vld [vmem:[#allocation5 + $0xd8] sm:$0xff] }
  0x45   :  { %1904 = vmatpush3.bf16.msra.mxu1 %v1903_v38  ;;  %1874 = vmatprep.subr.bf16.mxu0 %v1873_v39  ;;  %v99_v60 = vld [vmem:[#allocation5 + $0x148] sm:$0xff]  ;;  %v116_v1 = vld [vmem:[#allocation5 + $0x1d0] sm:$0xff]  ;;  %v117_v2 = vld [vmem:[#allocation5 + $0x1d8] sm:$0xff]  ;;  %v1879_v3 = vpack.c.bf16 %v67_v57, %v66_v56  ;;  %v1881_v5 = vpack.c.bf16 %v85_v62, %v84_v61 }
  0x46   :  { %1906 = vmatprep.subr.bf16.mxu1 %v1905_v43  ;;  %v1911_v4 = vpack.c.bf16 %v99_v60, %v98_v58  ;;  %v68_v6 = vld [vmem:[#allocation5 + $0x50] sm:$0xff]  ;;  %v69_v7 = vld [vmem:[#allocation5 + $0x58] sm:$0xff]  ;;  %v1913_v9 = vpack.c.bf16 %v117_v2, %v116_v1  ;;  %v86_v11 = vld [vmem:[#allocation5 + $0xe0] sm:$0xff] }
  0x47   :  { %v100_v8 = vld [vmem:[#allocation5 + $0x150] sm:$0xff]  ;;  %v101_v10 = vld [vmem:[#allocation5 + $0x158] sm:$0xff]  ;;  %v87_v12 = vld [vmem:[#allocation5 + $0xe8] sm:$0xff]  ;;  %v1883_v16 = vpack.c.bf16 %v69_v7, %v68_v6 }
  0x48   :  { %1876 = vmatpush3.bf16.msra.mxu0 %v1875_v53  ;;  %v118_v14 = vld [vmem:[#allocation5 + $0x1e0] sm:$0xff]  ;;  %v119_v15 = vld [vmem:[#allocation5 + $0x1e8] sm:$0xff]  ;;  %v1915_v18 = vpack.c.bf16 %v101_v10, %v100_v8  ;;  %v1885_v19 = vpack.c.bf16 %v87_v12, %v86_v11  ;;  %v52_v22 = vld [vmem:[#allocation2] sm:$0xff] }
  0x49   :  { %1908 = vmatpush3.bf16.msra.mxu1 %v1907_v54  ;;  %1878 = vmatprep.subr.bf16.mxu0 %v1877_v55  ;;  %v70_v17 = vld [vmem:[#allocation5 + $0x60] sm:$0xff]  ;;  %v71_v20 = vld [vmem:[#allocation5 + $0x68] sm:$0xff]  ;;  %v1917_v23 = vpack.c.bf16 %v119_v15, %v118_v14  ;;  %v88_v25 = vld [vmem:[#allocation5 + $0xf0] sm:$0xff]  ;;  %v455_v27 = vrot.slane %v52_v22, %v2415_v13  ;;  %v448_v28 = vcombine.high %v52_v22, %v52_v22 }
  0x4a   :  { %1910 = vmatprep.subr.bf16.mxu1 %v1909_v59  ;;  %v102_v21 = vld [vmem:[#allocation5 + $0x160] sm:$0xff]  ;;  %v103_v24 = vld [vmem:[#allocation5 + $0x168] sm:$0xff]  ;;  %v89_v26 = vld [vmem:[#allocation5 + $0xf8] sm:$0xff]  ;;  %v1887_v31 = vpack.c.bf16 %v71_v20, %v70_v17 }
  0x4b   :  { %v120_v29 = vld [vmem:[#allocation5 + $0x1f0] sm:$0xff]  ;;  %v121_v30 = vld [vmem:[#allocation5 + $0x1f8] sm:$0xff]  ;;  %v463_v32 = vcombine.high %v455_v27, %v455_v27  ;;  %v462_v33 = vrot.slane %v448_v28, %v2415_v13  ;;  %v1919_v34 = vpack.c.bf16 %v103_v24, %v102_v21  ;;  %v1889_v35 = vpack.c.bf16 %v89_v26, %v88_v25  ;;  %v138_v42 = vld [vmem:[#allocation5 + $0x280] sm:$0xff] }
  0x4c   :  { %1880 = vmatpush3.bf16.msra.mxu0 %v1879_v3  ;;  %v72_v36 = vld [vmem:[#allocation5 + $0x70] sm:$0xff]  ;;  %v73_v37 = vld [vmem:[#allocation5 + $0x78] sm:$0xff]  ;;  %v1921_v39 = vpack.c.bf16 %v121_v30, %v120_v29  ;;  %v139_v43 = vld [vmem:[#allocation5 + $0x288] sm:$0xff] }
  0x4d   :  { %1912 = vmatpush3.bf16.msra.mxu1 %v1911_v4  ;;  %1882 = vmatprep.subr.bf16.mxu0 %v1881_v5  ;;  %v104_v38 = vld [vmem:[#allocation5 + $0x170] sm:$0xff]  ;;  %v105_v40 = vld [vmem:[#allocation5 + $0x178] sm:$0xff]  ;;  %v464_v41 = vcombine.high %v462_v33, %v462_v33  ;;  %v170_v44 = vld [vmem:[#allocation5 + $0x380] sm:$0xff]  ;;  %v1891_v46 = vpack.c.bf16 %v73_v37, %v72_v36  ;;  %v1925_v48 = vpack.c.bf16 %v139_v43, %v138_v42 }
  0x4e   :  { %1914 = vmatprep.subr.bf16.mxu1 %v1913_v9  ;;  %638 = vmatprep.mubr.f32.mxu0 %v463_v32  ;;  %v171_v45 = vld [vmem:[#allocation5 + $0x388] sm:$0xff]  ;;  %v1923_v47 = vpack.c.bf16 %v105_v40, %v104_v38  ;;  %v122_v49 = vld [vmem:[#allocation5 + $0x200] sm:$0xff]  ;;  %v140_v54 = vld [vmem:[#allocation5 + $0x290] sm:$0xff] }
  0x4f   :  { %708 = vmatprep.mubr.f32.mxu1 %v464_v41  ;;  %v123_v50 = vld [vmem:[#allocation5 + $0x208] sm:$0xff]  ;;  %v154_v51 = vld [vmem:[#allocation5 + $0x300] sm:$0xff]  ;;  %v1957_v52 = vpack.c.bf16 %v171_v45, %v170_v44  ;;  %v141_v55 = vld [vmem:[#allocation5 + $0x298] sm:$0xff] }
  0x50   :  { %1884 = vmatpush3.bf16.msra.mxu0 %v1883_v16  ;;  %v155_v53 = vld [vmem:[#allocation5 + $0x308] sm:$0xff]  ;;  %v172_v56 = vld [vmem:[#allocation5 + $0x390] sm:$0xff]  ;;  %v173_v57 = vld [vmem:[#allocation5 + $0x398] sm:$0xff]  ;;  %v1927_v58 = vpack.c.bf16 %v123_v50, %v122_v49  ;;  %v1929_v60 = vpack.c.bf16 %v141_v55, %v140_v54 }
  0x51   :  { %1916 = vmatpush3.bf16.msra.mxu1 %v1915_v18  ;;  %1886 = vmatprep.subr.bf16.mxu0 %v1885_v19  ;;  %v1959_v59 = vpack.c.bf16 %v155_v53, %v154_v51  ;;  %v124_v61 = vld [vmem:[#allocation5 + $0x210] sm:$0xff]  ;;  %v125_v62 = vld [vmem:[#allocation5 + $0x218] sm:$0xff]  ;;  %v1961_v0 = vpack.c.bf16 %v173_v57, %v172_v56  ;;  %v142_v2 = vld [vmem:[#allocation5 + $0x2a0] sm:$0xff] }
  0x52   :  { %1918 = vmatprep.subr.bf16.mxu1 %v1917_v23  ;;  %v156_v63 = vld [vmem:[#allocation5 + $0x310] sm:$0xff]  ;;  %v157_v1 = vld [vmem:[#allocation5 + $0x318] sm:$0xff]  ;;  %v143_v3 = vld [vmem:[#allocation5 + $0x2a8] sm:$0xff]  ;;  %v1931_v6 = vpack.c.bf16 %v125_v62, %v124_v61 }
  0x53   :  { %v174_v4 = vld [vmem:[#allocation5 + $0x3a0] sm:$0xff]  ;;  %v175_v5 = vld [vmem:[#allocation5 + $0x3a8] sm:$0xff]  ;;  %v1963_v7 = vpack.c.bf16 %v157_v1, %v156_v63  ;;  %v1933_v8 = vpack.c.bf16 %v143_v3, %v142_v2  ;;  %v144_v15 = vld [vmem:[#allocation5 + $0x2b0] sm:$0xff] }
  0x54   :  { %1888 = vmatpush3.bf16.msra.mxu0 %v1887_v31  ;;  %v126_v9 = vld [vmem:[#allocation5 + $0x220] sm:$0xff]  ;;  %v127_v10 = vld [vmem:[#allocation5 + $0x228] sm:$0xff]  ;;  %v1965_v12 = vpack.c.bf16 %v175_v5, %v174_v4  ;;  %v145_v16 = vld [vmem:[#allocation5 + $0x2b8] sm:$0xff] }
  0x55   :  { %1920 = vmatpush3.bf16.msra.mxu1 %v1919_v34  ;;  %1890 = vmatprep.subr.bf16.mxu0 %v1889_v35  ;;  %v158_v11 = vld [vmem:[#allocation5 + $0x320] sm:$0xff]  ;;  %v159_v14 = vld [vmem:[#allocation5 + $0x328] sm:$0xff]  ;;  %v176_v17 = vld [vmem:[#allocation5 + $0x3b0] sm:$0xff]  ;;  %v1935_v19 = vpack.c.bf16 %v127_v10, %v126_v9  ;;  %v1937_v21 = vpack.c.bf16 %v145_v16, %v144_v15 }
  0x56   :  { %1922 = vmatprep.subr.bf16.mxu1 %v1921_v39  ;;  %v177_v18 = vld [vmem:[#allocation5 + $0x3b8] sm:$0xff]  ;;  %v1967_v20 = vpack.c.bf16 %v159_v14, %v158_v11  ;;  %v128_v22 = vld [vmem:[#allocation5 + $0x230] sm:$0xff]  ;;  %v147_v28 = vld [vmem:[#allocation5 + $0x2c8] sm:$0xff] }
  0x57   :  { %v129_v23 = vld [vmem:[#allocation5 + $0x238] sm:$0xff]  ;;  %v160_v24 = vld [vmem:[#allocation5 + $0x330] sm:$0xff]  ;;  %v1969_v25 = vpack.c.bf16 %v177_v18, %v176_v17  ;;  %v178_v29 = vld [vmem:[#allocation5 + $0x3c0] sm:$0xff] }
  0x58   :  { %1892 = vmatpush3.bf16.msra.mxu0 %v1891_v46  ;;  %v161_v26 = vld [vmem:[#allocation5 + $0x338] sm:$0xff]  ;;  %v179_v30 = vld [vmem:[#allocation5 + $0x3c8] sm:$0xff]  ;;  %v1939_v32 = vpack.c.bf16 %v129_v23, %v128_v22  ;;  %v130_v37 = vld [vmem:[#allocation5 + $0x240] sm:$0xff] }
  0x59   :  { %1924 = vmatpush3.bf16.msra.mxu1 %v1923_v47  ;;  %1926 = vmatprep.subr.bf16.mxu0 %v1925_v48  ;;  %v53_v31 = vld [vmem:[#allocation2 + $0x8] sm:$0xff]  ;;  %v1971_v35 = vpack.c.bf16 %v161_v26, %v160_v24  ;;  %v131_v38 = vld [vmem:[#allocation5 + $0x248] sm:$0xff]  ;;  %v162_v39 = vld [vmem:[#allocation5 + $0x340] sm:$0xff]  ;;  %v1973_v40 = vpack.c.bf16 %v179_v30, %v178_v29 }
  0x5a   :  { %1958 = vmatprep.subr.bf16.mxu1 %v1957_v52  ;;  %v465_v34 = vcombine.high %v53_v31, %v53_v31  ;;  %v163_v41 = vld [vmem:[#allocation5 + $0x348] sm:$0xff]  ;;  %v148_v42 = vld [vmem:[#allocation5 + $0x2d0] sm:$0xff]  ;;  %v149_v43 = vld [vmem:[#allocation5 + $0x2d8] sm:$0xff]  ;;  %v1943_v48 = vpack.c.bf16 %v131_v38, %v130_v37 }
  0x5b   :  { %639 = vmatmul.mubr.f32.vlgmr.msra.gmra.mrb[0].mxu0 %v455_v27  ;;  %v146_v27 = vld [vmem:[#allocation5 + $0x2c0] sm:$0xff]  ;;  %v180_v46 = vld [vmem:[#allocation5 + $0x3d0] sm:$0xff]  ;;  %v181_v47 = vld [vmem:[#allocation5 + $0x3d8] sm:$0xff]  ;;  %v1975_v50 = vpack.c.bf16 %v163_v41, %v162_v39  ;;  %v1945_v51 = vpack.c.bf16 %v149_v43, %v148_v42 }
  0x5c   :  { %709 = vmatmul.mubr.f32.vlgmr.msra.gmra.mrb[0].mxu1 %v462_v33  ;;  %1928 = vmatpush3.bf16.msra.mxu0 %v1927_v58  ;;  %v2420_v33 = vrot.slane %v53_v31, %v2415_v13  ;;  %v1941_v36 = vpack.c.bf16 %v147_v28, %v146_v27  ;;  %v2425_v45 = vrot.slane %v465_v34, %v2415_v13  ;;  %v132_v52 = vld [vmem:[#allocation5 + $0x250] sm:$0xff]  ;;  %v133_v53 = vld [vmem:[#allocation5 + $0x258] sm:$0xff]  ;;  %v150_v57 = vld [vmem:[#allocation5 + $0x2e0] sm:$0xff] }
  0x5d   :  { %1960 = vmatpush3.bf16.msra.mxu1 %v1959_v59  ;;  %1930 = vmatprep.subr.bf16.mxu0 %v1929_v60  ;;  %v164_v54 = vld [vmem:[#allocation5 + $0x350] sm:$0xff]  ;;  %v1977_v55 = vpack.c.bf16 %v181_v47, %v180_v46  ;;  %v165_v56 = vld [vmem:[#allocation5 + $0x358] sm:$0xff]  ;;  %v151_v58 = vld [vmem:[#allocation5 + $0x2e8] sm:$0xff]  ;;  %v1947_v61 = vpack.c.bf16 %v133_v53, %v132_v52 }
  0x5e   :  { %1962 = vmatprep.subr.bf16.mxu1 %v1961_v0  ;;  %v480_v44 = vcombine.high %v2420_v33, %v2420_v33  ;;  %v481_v49 = vcombine.high %v2425_v45, %v2425_v45  ;;  %v182_v59 = vld [vmem:[#allocation5 + $0x3e0] sm:$0xff]  ;;  %v183_v60 = vld [vmem:[#allocation5 + $0x3e8] sm:$0xff]  ;;  %v1979_v62 = vpack.c.bf16 %v165_v56, %v164_v54  ;;  %v1949_v63 = vpack.c.bf16 %v151_v58, %v150_v57  ;;  %v152_v5 = vld [vmem:[#allocation5 + $0x2f0] sm:$0xff] }
  0x5f   :  { %v134_v0 = vld [vmem:[#allocation5 + $0x260] sm:$0xff]  ;;  %v135_v1 = vld [vmem:[#allocation5 + $0x268] sm:$0xff]  ;;  %v1981_v3 = vpack.c.bf16 %v183_v60, %v182_v59  ;;  %v137_v14 = vld [vmem:[#allocation5 + $0x278] sm:$0xff] }
  0x60   :  { %1932 = vmatpush3.bf16.msra.mxu0 %v1931_v6  ;;  %778 = vmatprep.mubr.f32.mxu0 %v480_v44  ;;  %v166_v2 = vld [vmem:[#allocation5 + $0x360] sm:$0xff]  ;;  %v167_v4 = vld [vmem:[#allocation5 + $0x368] sm:$0xff]  ;;  %v153_v6 = vld [vmem:[#allocation5 + $0x2f8] sm:$0xff]  ;;  %v1951_v9 = vpack.c.bf16 %v135_v1, %v134_v0 }
  0x61   :  { %1964 = vmatpush3.bf16.msra.mxu1 %v1963_v7  ;;  %1934 = vmatprep.subr.bf16.mxu0 %v1933_v8  ;;  %v184_v7 = vld [vmem:[#allocation5 + $0x3f0] sm:$0xff]  ;;  %v185_v8 = vld [vmem:[#allocation5 + $0x3f8] sm:$0xff]  ;;  %v1983_v10 = vpack.c.bf16 %v167_v4, %v166_v2  ;;  %v1953_v11 = vpack.c.bf16 %v153_v6, %v152_v5  ;;  %v202_v18 = vld [vmem:[#allocation5 + $0x480] sm:$0xff] }
  0x62   :  { %1966 = vmatprep.subr.bf16.mxu1 %v1965_v12  ;;  %848 = vmatprep.mubr.f32.mxu1 %v481_v49  ;;  %v136_v12 = vld [vmem:[#allocation5 + $0x270] sm:$0xff]  ;;  %v1985_v16 = vpack.c.bf16 %v185_v8, %v184_v7  ;;  %v169_v17 = vld [vmem:[#allocation5 + $0x378] sm:$0xff]  ;;  %v186_v23 = vld [vmem:[#allocation5 + $0x400] sm:$0xff] }
  0x63   :  { %v168_v15 = vld [vmem:[#allocation5 + $0x370] sm:$0xff]  ;;  %v1955_v22 = vpack.c.bf16 %v137_v14, %v136_v12  ;;  %v187_v26 = vld [vmem:[#allocation5 + $0x408] sm:$0xff]  ;;  %v218_v27 = vld [vmem:[#allocation5 + $0x500] sm:$0xff] }
  0x64   :  { %1936 = vmatpush3.bf16.msra.mxu0 %v1935_v19  ;;  %v203_v19 = vld [vmem:[#allocation5 + $0x488] sm:$0xff]  ;;  %v1987_v24 = vpack.c.bf16 %v169_v17, %v168_v15  ;;  %v204_v30 = vld [vmem:[#allocation5 + $0x490] sm:$0xff]  ;;  %v205_v31 = vld [vmem:[#allocation5 + $0x498] sm:$0xff] }
  0x65   :  { %1968 = vmatpush3.bf16.msra.mxu1 %v1967_v20  ;;  %1938 = vmatprep.subr.bf16.mxu0 %v1937_v21  ;;  %v234_v20 = vld [vmem:[#allocation5 + $0x580] sm:$0xff]  ;;  %v235_v21 = vld [vmem:[#allocation5 + $0x588] sm:$0xff]  ;;  %v237_v34 = vld [vmem:[#allocation5 + $0x598] sm:$0xff]  ;;  %v1993_v38 = vpack.c.bf16 %v205_v31, %v204_v30 }
  0x66   :  { %1970 = vmatprep.subr.bf16.mxu1 %v1969_v25  ;;  %v1989_v25 = vpack.c.bf16 %v203_v19, %v202_v18  ;;  %v219_v28 = vld [vmem:[#allocation5 + $0x508] sm:$0xff]  ;;  %v2021_v29 = vpack.c.bf16 %v235_v21, %v234_v20  ;;  %v54_v37 = vld [vmem:[#allocation2 + $0x10] sm:$0xff]  ;;  %v188_v39 = vld [vmem:[#allocation5 + $0x410] sm:$0xff] }
  0x67   :  { %v220_v41 = vld [vmem:[#allocation5 + $0x510] sm:$0xff]  ;;  %v2430_v42 = vrot.slane %v54_v37, %v2415_v13  ;;  %v482_v43 = vcombine.high %v54_v37, %v54_v37  ;;  %v221_v46 = vld [vmem:[#allocation5 + $0x518] sm:$0xff]  ;;  %v206_v47 = vld [vmem:[#allocation5 + $0x4a0] sm:$0xff] }
  0x68   :  { %1940 = vmatpush3.bf16.msra.mxu0 %v1939_v32  ;;  %v236_v32 = vld [vmem:[#allocation5 + $0x590] sm:$0xff]  ;;  %v238_v49 = vld [vmem:[#allocation5 + $0x5a0] sm:$0xff]  ;;  %v2027_v54 = vpack.c.bf16 %v221_v46, %v220_v41  ;;  %v191_v57 = vld [vmem:[#allocation5 + $0x428] sm:$0xff] }
  0x69   :  { %1972 = vmatpush3.bf16.msra.mxu1 %v1971_v35  ;;  %1942 = vmatprep.subr.bf16.mxu0 %v1941_v36  ;;  %v1991_v35 = vpack.c.bf16 %v187_v26, %v186_v23  ;;  %v2023_v36 = vpack.c.bf16 %v219_v28, %v218_v27  ;;  %v2025_v44 = vpack.c.bf16 %v237_v34, %v236_v32  ;;  %v190_v56 = vld [vmem:[#allocation5 + $0x420] sm:$0xff]  ;;  %v223_v60 = vld [vmem:[#allocation5 + $0x528] sm:$0xff]  ;;  %v241_v0 = vld [vmem:[#allocation5 + $0x5b8] sm:$0xff] }
  0x6a   :  { %1974 = vmatprep.subr.bf16.mxu1 %v1973_v40  ;;  %v189_v40 = vld [vmem:[#allocation5 + $0x418] sm:$0xff]  ;;  %v2436_v52 = vrot.slane %v482_v43, %v2415_v13  ;;  %v222_v58 = vld [vmem:[#allocation5 + $0x520] sm:$0xff]  ;;  %v224_v5 = vld [vmem:[#allocation5 + $0x530] sm:$0xff] }
  0x6b   :  { %v1995_v53 = vpack.c.bf16 %v189_v40, %v188_v39  ;;  %v2031_v1 = vpack.c.bf16 %v223_v60, %v222_v58  ;;  %v193_v4 = vld [vmem:[#allocation5 + $0x438] sm:$0xff]  ;;  %v210_v8 = vld [vmem:[#allocation5 + $0x4c0] sm:$0xff]  ;;  %v195_v17 = vld [vmem:[#allocation5 + $0x448] sm:$0xff] }
  0x6c   :  { %1944 = vmatpush3.bf16.msra.mxu0 %v1943_v48  ;;  %v207_v48 = vld [vmem:[#allocation5 + $0x4a8] sm:$0xff]  ;;  %v225_v7 = vld [vmem:[#allocation5 + $0x538] sm:$0xff]  ;;  %v226_v18 = vld [vmem:[#allocation5 + $0x540] sm:$0xff] }
  0x6d   :  { %1976 = vmatpush3.bf16.msra.mxu1 %v1975_v50  ;;  %1946 = vmatprep.subr.bf16.mxu0 %v1945_v51  ;;  %v239_v50 = vld [vmem:[#allocation5 + $0x5a8] sm:$0xff]  ;;  %v497_v51 = vcombine.high %v2430_v42, %v2430_v42  ;;  %v2035_v14 = vpack.c.bf16 %v225_v7, %v224_v5  ;;  %v212_v21 = vld [vmem:[#allocation5 + $0x4d0] sm:$0xff]  ;;  %v229_v32 = vld [vmem:[#allocation5 + $0x558] sm:$0xff] }
  0x6e   :  { %1978 = vmatprep.subr.bf16.mxu1 %v1977_v55  ;;  %v1997_v55 = vpack.c.bf16 %v207_v48, %v206_v47  ;;  %v2029_v59 = vpack.c.bf16 %v239_v50, %v238_v49  ;;  %v227_v20 = vld [vmem:[#allocation5 + $0x548] sm:$0xff]  ;;  %v244_v23 = vld [vmem:[#allocation5 + $0x5d0] sm:$0xff]  ;;  %v214_v34 = vld [vmem:[#allocation5 + $0x4e0] sm:$0xff] }
  0x6f   :  { %v2039_v26 = vpack.c.bf16 %v227_v20, %v226_v18  ;;  %v196_v28 = vld [vmem:[#allocation5 + $0x450] sm:$0xff]  ;;  %v247_v37 = vld [vmem:[#allocation5 + $0x5e8] sm:$0xff]  ;;  %v198_v41 = vld [vmem:[#allocation5 + $0x460] sm:$0xff] }
  0x70   :  { %1948 = vmatpush3.bf16.msra.mxu0 %v1947_v61  ;;  %v208_v61 = vld [vmem:[#allocation5 + $0x4b0] sm:$0xff]  ;;  %v199_v43 = vld [vmem:[#allocation5 + $0x468] sm:$0xff]  ;;  %v217_v49 = vld [vmem:[#allocation5 + $0x4f8] sm:$0xff] }
  0x71   :  { %1980 = vmatpush3.bf16.msra.mxu1 %v1979_v62  ;;  %1950 = vmatprep.subr.bf16.mxu0 %v1949_v63  ;;  %v209_v62 = vld [vmem:[#allocation5 + $0x4b8] sm:$0xff]  ;;  %v240_v63 = vld [vmem:[#allocation5 + $0x5b0] sm:$0xff]  ;;  %v231_v47 = vld [vmem:[#allocation5 + $0x568] sm:$0xff] }
  0x72   :  { %1982 = vmatprep.subr.bf16.mxu1 %v1981_v3  ;;  %v2001_v2 = vpack.c.bf16 %v209_v62, %v208_v61  ;;  %v192_v3 = vld [vmem:[#allocation5 + $0x430] sm:$0xff]  ;;  %v2033_v6 = vpack.c.bf16 %v241_v0, %v240_v63  ;;  %v201_v58 = vld [vmem:[#allocation5 + $0x478] sm:$0xff]  ;;  %v266_v61 = vld [vmem:[#allocation5 + $0x680] sm:$0xff] }
  0x73   :  { %v2003_v12 = vpack.c.bf16 %v193_v4, %v192_v3  ;;  %v228_v30 = vld [vmem:[#allocation5 + $0x550] sm:$0xff]  ;;  %v233_v60 = vld [vmem:[#allocation5 + $0x578] sm:$0xff]  ;;  %v267_v62 = vld [vmem:[#allocation5 + $0x688] sm:$0xff] }
  0x74   :  { %1952 = vmatpush3.bf16.msra.mxu0 %v1951_v9  ;;  %v211_v9 = vld [vmem:[#allocation5 + $0x4c8] sm:$0xff]  ;;  %v2043_v39 = vpack.c.bf16 %v229_v32, %v228_v30  ;;  %v216_v48 = vld [vmem:[#allocation5 + $0x4f0] sm:$0xff]  ;;  %v298_v63 = vld [vmem:[#allocation5 + $0x780] sm:$0xff]  ;;  %v2053_v3 = vpack.c.bf16 %v267_v62, %v266_v61 }
  0x75   :  { %1984 = vmatpush3.bf16.msra.mxu1 %v1983_v10  ;;  %1954 = vmatprep.subr.bf16.mxu0 %v1953_v11  ;;  %v242_v10 = vld [vmem:[#allocation5 + $0x5c0] sm:$0xff]  ;;  %v243_v11 = vld [vmem:[#allocation5 + $0x5c8] sm:$0xff]  ;;  %v2005_v15 = vpack.c.bf16 %v211_v9, %v210_v8  ;;  %v248_v50 = vld [vmem:[#allocation5 + $0x5f0] sm:$0xff] }
  0x76   :  { %1986 = vmatprep.subr.bf16.mxu1 %v1985_v16  ;;  %v194_v16 = vld [vmem:[#allocation5 + $0x440] sm:$0xff]  ;;  %v2037_v19 = vpack.c.bf16 %v243_v11, %v242_v10  ;;  %v299_v0 = vld [vmem:[#allocation5 + $0x788] sm:$0xff]  ;;  %v268_v9 = vld [vmem:[#allocation5 + $0x690] sm:$0xff] }
  0x77   :  { %v250_v4 = vld [vmem:[#allocation5 + $0x600] sm:$0xff]  ;;  %v251_v5 = vld [vmem:[#allocation5 + $0x608] sm:$0xff]  ;;  %v2085_v7 = vpack.c.bf16 %v299_v0, %v298_v63  ;;  %v269_v10 = vld [vmem:[#allocation5 + $0x698] sm:$0xff] }
  0x78   :  { %1956 = vmatpush3.bf16.msra.mxu0 %v1955_v22  ;;  %v213_v22 = vld [vmem:[#allocation5 + $0x4d8] sm:$0xff]  ;;  %v283_v8 = vld [vmem:[#allocation5 + $0x708] sm:$0xff]  ;;  %v2057_v18 = vpack.c.bf16 %v269_v10, %v268_v9  ;;  %v276_v63 = vld [vmem:[#allocation5 + $0x6d0] sm:$0xff] }
  0x79   :  { %1988 = vmatpush3.bf16.msra.mxu1 %v1987_v24  ;;  %1990 = vmatprep.subr.bf16.mxu0 %v1989_v25  ;;  %v245_v24 = vld [vmem:[#allocation5 + $0x5d8] sm:$0xff]  ;;  %v2007_v25 = vpack.c.bf16 %v195_v17, %v194_v16  ;;  %v2009_v27 = vpack.c.bf16 %v213_v22, %v212_v21  ;;  %v2055_v16 = vpack.c.bf16 %v251_v5, %v250_v4  ;;  %v284_v21 = vld [vmem:[#allocation5 + $0x710] sm:$0xff]  ;;  %v291_v62 = vld [vmem:[#allocation5 + $0x748] sm:$0xff] }
  0x7a   :  { %2022 = vmatprep.subr.bf16.mxu1 %v2021_v29  ;;  %v197_v29 = vld [vmem:[#allocation5 + $0x458] sm:$0xff]  ;;  %v2041_v31 = vpack.c.bf16 %v245_v24, %v244_v23  ;;  %v270_v24 = vld [vmem:[#allocation5 + $0x6a0] sm:$0xff]  ;;  %v260_v5 = vld [vmem:[#allocation5 + $0x650] sm:$0xff] }
  0x7b   :  { %779 = vmatmul.mubr.f32.vlgmr.msra.gmra.mrb[2].mxu0 %v2420_v33  ;;  %v498_v33 = vcombine.high %v2436_v52, %v2436_v52  ;;  %v253_v20 = vld [vmem:[#allocation5 + $0x618] sm:$0xff]  ;;  %v278_v10 = vld [vmem:[#allocation5 + $0x6e0] sm:$0xff] }
  0x7c   :  { %1992 = vmatpush3.bf16.msra.mxu0 %v1991_v35  ;;  %849 = vmatmul.mubr.f32.vlgmr.msra.gmra.mrb[2].mxu1 %v2425_v45  ;;  %v1999_v45 = vpack.c.bf16 %v191_v57, %v190_v56  ;;  %v215_v35 = vld [vmem:[#allocation5 + $0x4e8] sm:$0xff]  ;;  %v2017_v56 = vpack.c.bf16 %v217_v49, %v216_v48  ;;  %v200_v57 = vld [vmem:[#allocation5 + $0x470] sm:$0xff]  ;;  %v285_v23 = vld [vmem:[#allocation5 + $0x718] sm:$0xff] }
  0x7d   :  { %2024 = vmatpush3.bf16.msra.mxu1 %v2023_v36  ;;  %1994 = vmatprep.subr.bf16.mxu0 %v1993_v38  ;;  %v246_v36 = vld [vmem:[#allocation5 + $0x5e0] sm:$0xff]  ;;  %v2011_v38 = vpack.c.bf16 %v197_v29, %v196_v28  ;;  %v2013_v40 = vpack.c.bf16 %v215_v35, %v214_v34  ;;  %v303_v28 = vld [vmem:[#allocation5 + $0x7a8] sm:$0xff]  ;;  %v288_v48 = vld [vmem:[#allocation5 + $0x730] sm:$0xff] }
  0x7e   :  { %2026 = vmatprep.subr.bf16.mxu1 %v2025_v44  ;;  %918 = vmatprep.mubr.f32.mxu0 %v497_v51  ;;  %v230_v44 = vld [vmem:[#allocation5 + $0x560] sm:$0xff]  ;;  %v2045_v46 = vpack.c.bf16 %v247_v37, %v246_v36  ;;  %v249_v51 = vld [vmem:[#allocation5 + $0x5f8] sm:$0xff]  ;;  %v255_v35 = vld [vmem:[#allocation5 + $0x628] sm:$0xff] }
  0x7f   :  { %988 = vmatprep.mubr.f32.mxu1 %v498_v33  ;;  %v232_v33 = vld [vmem:[#allocation5 + $0x570] sm:$0xff]  ;;  %v254_v34 = vld [vmem:[#allocation5 + $0x620] sm:$0xff]  ;;  %v277_v0 = vld [vmem:[#allocation5 + $0x6d8] sm:$0xff] }
  0x80   :  { %1996 = vmatpush3.bf16.msra.mxu0 %v1995_v53  ;;  %v2015_v53 = vpack.c.bf16 %v199_v43, %v198_v41  ;;  %v286_v36 = vld [vmem:[#allocation5 + $0x720] sm:$0xff]  ;;  %v305_v41 = vld [vmem:[#allocation5 + $0x7b8] sm:$0xff]  ;;  %v2063_v43 = vpack.c.bf16 %v255_v35, %v254_v34  ;;  %v2073_v4 = vpack.c.bf16 %v277_v0, %v276_v63  ;;  %v264_v34 = vld [vmem:[#allocation5 + $0x670] sm:$0xff] }
  0x81   :  { %2028 = vmatpush3.bf16.msra.mxu1 %v2027_v54  ;;  %1998 = vmatprep.subr.bf16.mxu0 %v1997_v55  ;;  %v55_v54 = vld [vmem:[#allocation2 + $0x18] sm:$0xff]  ;;  %v2047_v55 = vpack.c.bf16 %v231_v47, %v230_v44  ;;  %v257_v47 = vld [vmem:[#allocation5 + $0x638] sm:$0xff]  ;;  %v348_v63 = vld [vmem:[#allocation5 + $0x910] sm:$0xff] }
  0x82   :  { %2030 = vmatprep.subr.bf16.mxu1 %v2029_v59  ;;  %v2049_v59 = vpack.c.bf16 %v249_v51, %v248_v50  ;;  %v2442_v11 = vrot.slane %v55_v54, %v2415_v13  ;;  %v289_v50 = vld [vmem:[#allocation5 + $0x738] sm:$0xff]  ;;  %v274_v51 = vld [vmem:[#allocation5 + $0x6c0] sm:$0xff] }
  0x83   :  { %v293_v9 = vld [vmem:[#allocation5 + $0x758] sm:$0xff] }
  0x84   :  { %2000 = vmatpush3.bf16.msra.mxu0 %v1999_v45  ;;  %v499_v45 = vcombine.high %v55_v54, %v55_v54  ;;  %v306_v54 = vld [vmem:[#allocation5 + $0x7c0] sm:$0xff]  ;;  %v265_v35 = vld [vmem:[#allocation5 + $0x678] sm:$0xff] }
  0x85   :  { %2032 = vmatpush3.bf16.msra.mxu1 %v2031_v1  ;;  %2002 = vmatprep.subr.bf16.mxu0 %v2001_v2  ;;  %v2019_v1 = vpack.c.bf16 %v201_v58, %v200_v57  ;;  %v2051_v2 = vpack.c.bf16 %v233_v60, %v232_v33  ;;  %v2099_v57 = vpack.c.bf16 %v289_v50, %v288_v48  ;;  %v258_v33 = vld [vmem:[#allocation5 + $0x640] sm:$0xff]  ;;  %v315_v48 = vld [vmem:[#allocation5 + $0x808] sm:$0xff] }
  0x86   :  { %2034 = vmatprep.subr.bf16.mxu1 %v2033_v6  ;;  %v282_v6 = vld [vmem:[#allocation5 + $0x700] sm:$0xff] }
  0x87   :  { %v2087_v17 = vpack.c.bf16 %v283_v8, %v282_v6  ;;  %v290_v60 = vld [vmem:[#allocation5 + $0x740] sm:$0xff]  ;;  %v261_v6 = vld [vmem:[#allocation5 + $0x658] sm:$0xff] }
  0x88   :  { %2004 = vmatpush3.bf16.msra.mxu0 %v2003_v12  ;;  %v300_v12 = vld [vmem:[#allocation5 + $0x790] sm:$0xff] }
  0x89   :  { %2036 = vmatpush3.bf16.msra.mxu1 %v2035_v14  ;;  %2006 = vmatprep.subr.bf16.mxu0 %v2005_v15  ;;  %v301_v14 = vld [vmem:[#allocation5 + $0x798] sm:$0xff]  ;;  %v2445_v15 = vrot.slane %v499_v45, %v2415_v13  ;;  %v308_v45 = vld [vmem:[#allocation5 + $0x7d0] sm:$0xff] }
  0x8a   :  { %2038 = vmatprep.subr.bf16.mxu1 %v2037_v19  ;;  %v252_v19 = vld [vmem:[#allocation5 + $0x610] sm:$0xff]  ;;  %v2089_v22 = vpack.c.bf16 %v301_v14, %v300_v12  ;;  %v279_v12 = vld [vmem:[#allocation5 + $0x6e8] sm:$0xff]  ;;  %v310_v14 = vld [vmem:[#allocation5 + $0x7e0] sm:$0xff] }
  0x8b   :  { %v515_v29 = vcombine.high %v2445_v15, %v2445_v15  ;;  %v2059_v30 = vpack.c.bf16 %v253_v20, %v252_v19  ;;  %v2077_v19 = vpack.c.bf16 %v279_v12, %v278_v10  ;;  %v262_v20 = vld [vmem:[#allocation5 + $0x660] sm:$0xff]  ;;  %v319_v12 = vld [vmem:[#allocation5 + $0x828] sm:$0xff] }
  0x8c   :  { %2008 = vmatpush3.bf16.msra.mxu0 %v2007_v25  ;;  %v271_v25 = vld [vmem:[#allocation5 + $0x6a8] sm:$0xff]  ;;  %v318_v10 = vld [vmem:[#allocation5 + $0x820] sm:$0xff] }
  0x8d   :  { %2040 = vmatpush3.bf16.msra.mxu1 %v2039_v26  ;;  %2010 = vmatprep.subr.bf16.mxu0 %v2009_v27  ;;  %v514_v26 = vcombine.high %v2442_v11, %v2442_v11  ;;  %v302_v27 = vld [vmem:[#allocation5 + $0x7a0] sm:$0xff]  ;;  %v2061_v32 = vpack.c.bf16 %v271_v25, %v270_v24  ;;  %v295_v24 = vld [vmem:[#allocation5 + $0x768] sm:$0xff]  ;;  %v280_v25 = vld [vmem:[#allocation5 + $0x6f0] sm:$0xff] }
  0x8e   :  { %2042 = vmatprep.subr.bf16.mxu1 %v2041_v31  ;;  %v2091_v31 = vpack.c.bf16 %v285_v23, %v284_v21  ;;  %v2093_v37 = vpack.c.bf16 %v303_v28, %v302_v27  ;;  %v263_v21 = vld [vmem:[#allocation5 + $0x668] sm:$0xff]  ;;  %v312_v27 = vld [vmem:[#allocation5 + $0x7f0] sm:$0xff]  ;;  %v313_v28 = vld [vmem:[#allocation5 + $0x7f8] sm:$0xff] }
  0x90   :  { %2012 = vmatpush3.bf16.msra.mxu0 %v2011_v38  ;;  %v287_v38 = vld [vmem:[#allocation5 + $0x728] sm:$0xff] }
  0x91   :  { %2044 = vmatpush3.bf16.msra.mxu1 %v2043_v39  ;;  %2014 = vmatprep.subr.bf16.mxu0 %v2013_v40  ;;  %v273_v39 = vld [vmem:[#allocation5 + $0x6b8] sm:$0xff]  ;;  %v304_v40 = vld [vmem:[#allocation5 + $0x7b0] sm:$0xff] }
  0x92   :  { %2046 = vmatprep.subr.bf16.mxu1 %v2045_v46  ;;  %v256_v46 = vld [vmem:[#allocation5 + $0x630] sm:$0xff]  ;;  %v2097_v49 = vpack.c.bf16 %v305_v41, %v304_v40  ;;  %v362_v40 = vld [vmem:[#allocation5 + $0x980] sm:$0xff]  ;;  %v363_v41 = vld [vmem:[#allocation5 + $0x988] sm:$0xff] }
  0x93   :  { %v2149_v50 = vpack.c.bf16 %v363_v41, %v362_v40  ;;  %v340_v40 = vld [vmem:[#allocation5 + $0x8d0] sm:$0xff]  ;;  %v341_v41 = vld [vmem:[#allocation5 + $0x8d8] sm:$0xff] }
  0x94   :  { %2016 = vmatpush3.bf16.msra.mxu0 %v2015_v53  ;;  %v275_v53 = vld [vmem:[#allocation5 + $0x6c8] sm:$0xff] }
  0x95   :  { %2048 = vmatpush3.bf16.msra.mxu1 %v2047_v55  ;;  %2018 = vmatprep.subr.bf16.mxu0 %v2017_v56  ;;  %v307_v55 = vld [vmem:[#allocation5 + $0x7c8] sm:$0xff]  ;;  %v2067_v56 = vpack.c.bf16 %v257_v47, %v256_v46  ;;  %v2069_v58 = vpack.c.bf16 %v275_v53, %v274_v51  ;;  %v314_v47 = vld [vmem:[#allocation5 + $0x800] sm:$0xff]  ;;  %v332_v53 = vld [vmem:[#allocation5 + $0x890] sm:$0xff] }
  0x96   :  { %2050 = vmatprep.subr.bf16.mxu1 %v2049_v59  ;;  %v259_v59 = vld [vmem:[#allocation5 + $0x648] sm:$0xff]  ;;  %v2101_v61 = vpack.c.bf16 %v307_v55, %v306_v54  ;;  %v333_v54 = vld [vmem:[#allocation5 + $0x898] sm:$0xff] }
  0x97   :  { %v347_v51 = vld [vmem:[#allocation5 + $0x908] sm:$0xff] }
  0x98   :  { %2020 = vmatpush3.bf16.msra.mxu0 %v2019_v1  ;;  %v309_v1 = vld [vmem:[#allocation5 + $0x7d8] sm:$0xff] }
  0x99   :  { %2052 = vmatpush3.bf16.msra.mxu1 %v2051_v2  ;;  %2054 = vmatprep.subr.bf16.mxu0 %v2053_v3  ;;  %v2071_v2 = vpack.c.bf16 %v259_v59, %v258_v33  ;;  %v2103_v3 = vpack.c.bf16 %v291_v62, %v290_v60  ;;  %v2105_v8 = vpack.c.bf16 %v309_v1, %v308_v45  ;;  %v317_v62 = vld [vmem:[#allocation5 + $0x818] sm:$0xff]  ;;  %v334_v1 = vld [vmem:[#allocation5 + $0x8a0] sm:$0xff] }
  0x9a   :  { %2086 = vmatprep.subr.bf16.mxu1 %v2085_v7  ;;  %v292_v7 = vld [vmem:[#allocation5 + $0x750] sm:$0xff]  ;;  %v2119_v33 = vpack.c.bf16 %v315_v48, %v314_v47  ;;  %v2121_v60 = vpack.c.bf16 %v333_v54, %v332_v53  ;;  %v349_v45 = vld [vmem:[#allocation5 + $0x918] sm:$0xff]  ;;  %v2137_v47 = vpack.c.bf16 %v341_v41, %v340_v40  ;;  %v342_v54 = vld [vmem:[#allocation5 + $0x8e0] sm:$0xff] }
  0x9b   :  { %919 = vmatmul.mubr.f32.vlgmr.msra.gmra.mrb[4].mxu0 %v2430_v42  ;;  %v272_v42 = vld [vmem:[#allocation5 + $0x6b0] sm:$0xff]  ;;  %v357_v53 = vld [vmem:[#allocation5 + $0x958] sm:$0xff] }
  0x9c   :  { %2056 = vmatpush3.bf16.msra.mxu0 %v2055_v16  ;;  %989 = vmatmul.mubr.f32.vlgmr.msra.gmra.mrb[4].mxu1 %v2436_v52  ;;  %v2095_v52 = vpack.c.bf16 %v287_v38, %v286_v36  ;;  %v2065_v44 = vpack.c.bf16 %v273_v39, %v272_v42  ;;  %v311_v16 = vld [vmem:[#allocation5 + $0x7e8] sm:$0xff]  ;;  %v296_v36 = vld [vmem:[#allocation5 + $0x770] sm:$0xff]  ;;  %v297_v38 = vld [vmem:[#allocation5 + $0x778] sm:$0xff] }
  0x9d   :  { %2088 = vmatpush3.bf16.msra.mxu1 %v2087_v17  ;;  %2058 = vmatprep.subr.bf16.mxu0 %v2057_v18  ;;  %v2075_v17 = vpack.c.bf16 %v261_v6, %v260_v5  ;;  %v2107_v18 = vpack.c.bf16 %v293_v9, %v292_v7  ;;  %v2109_v23 = vpack.c.bf16 %v311_v16, %v310_v14  ;;  %v330_v42 = vld [vmem:[#allocation5 + $0x880] sm:$0xff]  ;;  %v331_v39 = vld [vmem:[#allocation5 + $0x888] sm:$0xff]  ;;  %v324_v48 = vld [vmem:[#allocation5 + $0x850] sm:$0xff] }
  0x9e   :  { %2090 = vmatprep.subr.bf16.mxu1 %v2089_v22  ;;  %1058 = vmatprep.mubr.f32.mxu0 %v514_v26  ;;  %v294_v22 = vld [vmem:[#allocation5 + $0x760] sm:$0xff]  ;;  %v281_v26 = vld [vmem:[#allocation5 + $0x6f8] sm:$0xff]  ;;  %v2117_v46 = vpack.c.bf16 %v331_v39, %v330_v42  ;;  %v367_v5 = vld [vmem:[#allocation5 + $0x9a8] sm:$0xff] }
  0x9f   :  { %1128 = vmatprep.mubr.f32.mxu1 %v515_v29  ;;  %v2079_v29 = vpack.c.bf16 %v263_v21, %v262_v20  ;;  %v350_v14 = vld [vmem:[#allocation5 + $0x920] sm:$0xff]  ;;  %v369_v20 = vld [vmem:[#allocation5 + $0x9b8] sm:$0xff]  ;;  %v2127_v21 = vpack.c.bf16 %v319_v12, %v318_v10  ;;  %v355_v39 = vld [vmem:[#allocation5 + $0x948] sm:$0xff] }
  0xa0   :  { %2060 = vmatpush3.bf16.msra.mxu0 %v2059_v30  ;;  %v56_v30 = vld [vmem:[#allocation2 + $0x20] sm:$0xff]  ;;  %v329_v12 = vld [vmem:[#allocation5 + $0x878] sm:$0xff] }
  0xa1   :  { %2092 = vmatpush3.bf16.msra.mxu1 %v2091_v31  ;;  %2062 = vmatprep.subr.bf16.mxu0 %v2061_v32  ;;  %v2111_v31 = vpack.c.bf16 %v295_v24, %v294_v22  ;;  %v2081_v32 = vpack.c.bf16 %v281_v26, %v280_v25  ;;  %v2454_v55 = vrot.slane %v56_v30, %v2415_v13  ;;  %v321_v24 = vld [vmem:[#allocation5 + $0x838] sm:$0xff]  ;;  %v352_v25 = vld [vmem:[#allocation5 + $0x930] sm:$0xff] }
  0xa2   :  { %2094 = vmatprep.subr.bf16.mxu1 %v2093_v37  ;;  %v2113_v37 = vpack.c.bf16 %v313_v28, %v312_v27  ;;  %v353_v27 = vld [vmem:[#allocation5 + $0x938] sm:$0xff]  ;;  %v338_v28 = vld [vmem:[#allocation5 + $0x8c0] sm:$0xff]  ;;  %v328_v10 = vld [vmem:[#allocation5 + $0x870] sm:$0xff] }
  0xa3   :  { %v412_v40 = vld [vmem:[#allocation5 + $0xb10] sm:$0xff] }
  0xa4   :  { %2064 = vmatpush3.bf16.msra.mxu0 %v2063_v43  ;;  %v516_v43 = vcombine.high %v56_v30, %v56_v30  ;;  %v370_v30 = vld [vmem:[#allocation5 + $0x9c0] sm:$0xff] }
  0xa5   :  { %2096 = vmatpush3.bf16.msra.mxu1 %v2095_v52  ;;  %2066 = vmatprep.subr.bf16.mxu0 %v2065_v44  ;;  %v2083_v52 = vpack.c.bf16 %v265_v35, %v264_v34  ;;  %v2115_v44 = vpack.c.bf16 %v297_v38, %v296_v36  ;;  %v2163_v34 = vpack.c.bf16 %v353_v27, %v352_v25  ;;  %v322_v36 = vld [vmem:[#allocation5 + $0x840] sm:$0xff]  ;;  %v379_v25 = vld [vmem:[#allocation5 + $0xa08] sm:$0xff] }
  0xa6   :  { %2098 = vmatprep.subr.bf16.mxu1 %v2097_v49  ;;  %v346_v49 = vld [vmem:[#allocation5 + $0x900] sm:$0xff] }
  0xa7   :  { %v2151_v59 = vpack.c.bf16 %v347_v51, %v346_v49  ;;  %v354_v38 = vld [vmem:[#allocation5 + $0x940] sm:$0xff]  ;;  %v325_v49 = vld [vmem:[#allocation5 + $0x858] sm:$0xff] }
  0xa8   :  { %2068 = vmatpush3.bf16.msra.mxu0 %v2067_v56  ;;  %v364_v56 = vld [vmem:[#allocation5 + $0x990] sm:$0xff] }
  0xa9   :  { %2100 = vmatpush3.bf16.msra.mxu1 %v2099_v57  ;;  %2070 = vmatprep.subr.bf16.mxu0 %v2069_v58  ;;  %v365_v57 = vld [vmem:[#allocation5 + $0x998] sm:$0xff]  ;;  %v2457_v58 = vrot.slane %v516_v43, %v2415_v13  ;;  %v372_v43 = vld [vmem:[#allocation5 + $0x9d0] sm:$0xff] }
  0xaa   :  { %2102 = vmatprep.subr.bf16.mxu1 %v2101_v61  ;;  %v316_v61 = vld [vmem:[#allocation5 + $0x810] sm:$0xff]  ;;  %v2153_v0 = vpack.c.bf16 %v365_v57, %v364_v56  ;;  %v343_v56 = vld [vmem:[#allocation5 + $0x8e8] sm:$0xff]  ;;  %v374_v57 = vld [vmem:[#allocation5 + $0x9e0] sm:$0xff] }
  0xab   :  { %v532_v6 = vcombine.high %v2457_v58, %v2457_v58  ;;  %v2123_v7 = vpack.c.bf16 %v317_v62, %v316_v61  ;;  %v2141_v61 = vpack.c.bf16 %v343_v56, %v342_v54  ;;  %v326_v62 = vld [vmem:[#allocation5 + $0x860] sm:$0xff]  ;;  %v383_v54 = vld [vmem:[#allocation5 + $0xa28] sm:$0xff] }
  0xac   :  { %2072 = vmatpush3.bf16.msra.mxu0 %v2071_v2  ;;  %v335_v2 = vld [vmem:[#allocation5 + $0x8a8] sm:$0xff]  ;;  %v414_v56 = vld [vmem:[#allocation5 + $0xb20] sm:$0xff] }
  0xad   :  { %2104 = vmatpush3.bf16.msra.mxu1 %v2103_v3  ;;  %2074 = vmatprep.subr.bf16.mxu0 %v2073_v4  ;;  %v531_v3 = vcombine.high %v2454_v55, %v2454_v55  ;;  %v366_v4 = vld [vmem:[#allocation5 + $0x9a0] sm:$0xff]  ;;  %v2125_v9 = vpack.c.bf16 %v335_v2, %v334_v1  ;;  %v359_v1 = vld [vmem:[#allocation5 + $0x968] sm:$0xff]  ;;  %v344_v2 = vld [vmem:[#allocation5 + $0x8f0] sm:$0xff] }
  0xae   :  { %2106 = vmatprep.subr.bf16.mxu1 %v2105_v8  ;;  %v2155_v8 = vpack.c.bf16 %v349_v45, %v348_v63  ;;  %v2157_v16 = vpack.c.bf16 %v367_v5, %v366_v4  ;;  %v327_v63 = vld [vmem:[#allocation5 + $0x868] sm:$0xff]  ;;  %v376_v4 = vld [vmem:[#allocation5 + $0x9f0] sm:$0xff]  ;;  %v377_v5 = vld [vmem:[#allocation5 + $0x9f8] sm:$0xff] }
  0xb0   :  { %2076 = vmatpush3.bf16.msra.mxu0 %v2075_v17  ;;  %v351_v17 = vld [vmem:[#allocation5 + $0x928] sm:$0xff] }
  0xb1   :  { %2108 = vmatpush3.bf16.msra.mxu1 %v2107_v18  ;;  %2078 = vmatprep.subr.bf16.mxu0 %v2077_v19  ;;  %v337_v18 = vld [vmem:[#allocation5 + $0x8b8] sm:$0xff]  ;;  %v368_v19 = vld [vmem:[#allocation5 + $0x9b0] sm:$0xff] }
  0xb2   :  { %2110 = vmatprep.subr.bf16.mxu1 %v2109_v23  ;;  %v320_v23 = vld [vmem:[#allocation5 + $0x830] sm:$0xff]  ;;  %v2161_v26 = vpack.c.bf16 %v369_v20, %v368_v19  ;;  %v426_v19 = vld [vmem:[#allocation5 + $0xb80] sm:$0xff]  ;;  %v427_v20 = vld [vmem:[#allocation5 + $0xb88] sm:$0xff] }
  0xb3   :  { %v2213_v27 = vpack.c.bf16 %v427_v20, %v426_v19  ;;  %v405_v19 = vld [vmem:[#allocation5 + $0xad8] sm:$0xff]  ;;  %v436_v20 = vld [vmem:[#allocation5 + $0xbd0] sm:$0xff] }
  0xb4   :  { %2080 = vmatpush3.bf16.msra.mxu0 %v2079_v29  ;;  %v339_v29 = vld [vmem:[#allocation5 + $0x8c8] sm:$0xff] }
  0xb5   :  { %2112 = vmatpush3.bf16.msra.mxu1 %v2111_v31  ;;  %2082 = vmatprep.subr.bf16.mxu0 %v2081_v32  ;;  %v371_v31 = vld [vmem:[#allocation5 + $0x9c8] sm:$0xff]  ;;  %v2131_v32 = vpack.c.bf16 %v321_v24, %v320_v23  ;;  %v2133_v35 = vpack.c.bf16 %v339_v29, %v338_v28  ;;  %v378_v24 = vld [vmem:[#allocation5 + $0xa00] sm:$0xff]  ;;  %v396_v29 = vld [vmem:[#allocation5 + $0xa90] sm:$0xff] }
  0xb6   :  { %2114 = vmatprep.subr.bf16.mxu1 %v2113_v37  ;;  %v323_v37 = vld [vmem:[#allocation5 + $0x848] sm:$0xff]  ;;  %v2165_v42 = vpack.c.bf16 %v371_v31, %v370_v30  ;;  %v397_v30 = vld [vmem:[#allocation5 + $0xa98] sm:$0xff] }
  0xb7   :  { %v411_v28 = vld [vmem:[#allocation5 + $0xb08] sm:$0xff] }
  0xb8   :  { %2084 = vmatpush3.bf16.msra.mxu0 %v2083_v52  ;;  %v373_v52 = vld [vmem:[#allocation5 + $0x9d8] sm:$0xff] }
  0xb9   :  { %2116 = vmatpush3.bf16.msra.mxu1 %v2115_v44  ;;  %2118 = vmatprep.subr.bf16.mxu0 %v2117_v46  ;;  %v2135_v44 = vpack.c.bf16 %v323_v37, %v322_v36  ;;  %v2167_v46 = vpack.c.bf16 %v355_v39, %v354_v38  ;;  %v2169_v51 = vpack.c.bf16 %v373_v52, %v372_v43  ;;  %v381_v39 = vld [vmem:[#allocation5 + $0xa18] sm:$0xff]  ;;  %v398_v52 = vld [vmem:[#allocation5 + $0xaa0] sm:$0xff] }
  0xba   :  { %2150 = vmatprep.subr.bf16.mxu1 %v2149_v50  ;;  %v356_v50 = vld [vmem:[#allocation5 + $0x950] sm:$0xff]  ;;  %v2183_v36 = vpack.c.bf16 %v379_v25, %v378_v24  ;;  %v2185_v38 = vpack.c.bf16 %v397_v30, %v396_v29  ;;  %v413_v43 = vld [vmem:[#allocation5 + $0xb18] sm:$0xff]  ;;  %v406_v29 = vld [vmem:[#allocation5 + $0xae0] sm:$0xff] }
  0xbb   :  { %1059 = vmatmul.mubr.f32.vlgmr.msra.gmra.mrb[6].mxu0 %v2442_v11  ;;  %v336_v11 = vld [vmem:[#allocation5 + $0x8b0] sm:$0xff]  ;;  %v389_v25 = vld [vmem:[#allocation5 + $0xa58] sm:$0xff]  ;;  %v407_v30 = vld [vmem:[#allocation5 + $0xae8] sm:$0xff] }
  0xbc   :  { %2120 = vmatpush3.bf16.msra.mxu0 %v2119_v33  ;;  %1129 = vmatmul.mubr.f32.vlgmr.msra.gmra.mrb[6].mxu1 %v2445_v15  ;;  %v2159_v15 = vpack.c.bf16 %v351_v17, %v350_v14  ;;  %v2129_v22 = vpack.c.bf16 %v337_v18, %v336_v11  ;;  %v375_v33 = vld [vmem:[#allocation5 + $0x9e8] sm:$0xff]  ;;  %v360_v14 = vld [vmem:[#allocation5 + $0x970] sm:$0xff]  ;;  %v361_v17 = vld [vmem:[#allocation5 + $0x978] sm:$0xff] }
  0xbd   :  { %2152 = vmatpush3.bf16.msra.mxu1 %v2151_v59  ;;  %2122 = vmatprep.subr.bf16.mxu0 %v2121_v60  ;;  %v2139_v59 = vpack.c.bf16 %v325_v49, %v324_v48  ;;  %v2171_v60 = vpack.c.bf16 %v357_v53, %v356_v50  ;;  %v2173_v45 = vpack.c.bf16 %v375_v33, %v374_v57  ;;  %v394_v11 = vld [vmem:[#allocation5 + $0xa80] sm:$0xff]  ;;  %v395_v18 = vld [vmem:[#allocation5 + $0xa88] sm:$0xff]  ;;  %v388_v24 = vld [vmem:[#allocation5 + $0xa50] sm:$0xff] }
  0xbe   :  { %2154 = vmatprep.subr.bf16.mxu1 %v2153_v0  ;;  %1198 = vmatprep.mubr.f32.mxu0 %v531_v3  ;;  %v358_v0 = vld [vmem:[#allocation5 + $0x960] sm:$0xff]  ;;  %v345_v3 = vld [vmem:[#allocation5 + $0x8f8] sm:$0xff]  ;;  %v2181_v23 = vpack.c.bf16 %v395_v18, %v394_v11  ;;  %v2219_v50 = vpack.c.bf16 %v413_v43, %v412_v40  ;;  %v415_v33 = vld [vmem:[#allocation5 + $0xb28] sm:$0xff] }
  0xbf   :  { %1268 = vmatprep.mubr.f32.mxu1 %v532_v6  ;;  %v2143_v6 = vpack.c.bf16 %v327_v63, %v326_v62  ;;  %v382_v53 = vld [vmem:[#allocation5 + $0xa20] sm:$0xff]  ;;  %v419_v11 = vld [vmem:[#allocation5 + $0xb48] sm:$0xff]  ;;  %v404_v18 = vld [vmem:[#allocation5 + $0xad0] sm:$0xff] }
  0xc0   :  { %2124 = vmatpush3.bf16.msra.mxu0 %v2123_v7  ;;  %v57_v7 = vld [vmem:[#allocation2 + $0x28] sm:$0xff]  ;;  %v2191_v62 = vpack.c.bf16 %v383_v54, %v382_v53  ;;  %v422_v40 = vld [vmem:[#allocation5 + $0xb60] sm:$0xff]  ;;  %v423_v43 = vld [vmem:[#allocation5 + $0xb68] sm:$0xff] }
  0xc1   :  { %2156 = vmatpush3.bf16.msra.mxu1 %v2155_v8  ;;  %2126 = vmatprep.subr.bf16.mxu0 %v2125_v9  ;;  %v2175_v8 = vpack.c.bf16 %v359_v1, %v358_v0  ;;  %v2145_v9 = vpack.c.bf16 %v345_v3, %v344_v2  ;;  %v2466_v31 = vrot.slane %v57_v7, %v2415_v13  ;;  %v384_v0 = vld [vmem:[#allocation5 + $0xa30] sm:$0xff]  ;;  %v417_v3 = vld [vmem:[#allocation5 + $0xb38] sm:$0xff] }
  0xc2   :  { %2158 = vmatprep.subr.bf16.mxu1 %v2157_v16  ;;  %v2177_v16 = vpack.c.bf16 %v377_v5, %v376_v4  ;;  %v416_v1 = vld [vmem:[#allocation5 + $0xb30] sm:$0xff]  ;;  %v402_v4 = vld [vmem:[#allocation5 + $0xac0] sm:$0xff]  ;;  %v403_v5 = vld [vmem:[#allocation5 + $0xac8] sm:$0xff] }
  0xc3   :  { %v424_v54 = vld [vmem:[#allocation5 + $0xb70] sm:$0xff] }
  0xc4   :  { %2128 = vmatpush3.bf16.msra.mxu0 %v2127_v21  ;;  %v533_v21 = vcombine.high %v57_v7, %v57_v7  ;;  %v435_v7 = vld [vmem:[#allocation5 + $0xbc8] sm:$0xff] }
  0xc5   :  { %2160 = vmatpush3.bf16.msra.mxu1 %v2159_v15  ;;  %2130 = vmatprep.subr.bf16.mxu0 %v2129_v22  ;;  %v2147_v15 = vpack.c.bf16 %v329_v12, %v328_v10  ;;  %v2179_v22 = vpack.c.bf16 %v361_v17, %v360_v14  ;;  %v2197_v10 = vpack.c.bf16 %v403_v5, %v402_v4  ;;  %v386_v12 = vld [vmem:[#allocation5 + $0xa40] sm:$0xff]  ;;  %v387_v14 = vld [vmem:[#allocation5 + $0xa48] sm:$0xff] }
  0xc6   :  { %2162 = vmatprep.subr.bf16.mxu1 %v2161_v26  ;;  %v410_v26 = vld [vmem:[#allocation5 + $0xb00] sm:$0xff] }
  0xc7   :  { %v2215_v37 = vpack.c.bf16 %v411_v28, %v410_v26  ;;  %v420_v26 = vld [vmem:[#allocation5 + $0xb50] sm:$0xff]  ;;  %v421_v28 = vld [vmem:[#allocation5 + $0xb58] sm:$0xff] }
  0xc8   :  { %2132 = vmatpush3.bf16.msra.mxu0 %v2131_v32  ;;  %v428_v32 = vld [vmem:[#allocation5 + $0xb90] sm:$0xff] }
  0xc9   :  { %2164 = vmatpush3.bf16.msra.mxu1 %v2163_v34  ;;  %2134 = vmatprep.subr.bf16.mxu0 %v2133_v35  ;;  %v429_v34 = vld [vmem:[#allocation5 + $0xb98] sm:$0xff]  ;;  %v2469_v35 = vrot.slane %v533_v21, %v2415_v13  ;;  %v430_v13 = vld [vmem:[#allocation5 + $0xba0] sm:$0xff] }
  0xca   :  { %2166 = vmatprep.subr.bf16.mxu1 %v2165_v42  ;;  %v380_v42 = vld [vmem:[#allocation5 + $0xa10] sm:$0xff]  ;;  %v2217_v41 = vpack.c.bf16 %v429_v34, %v428_v32  ;;  %v437_v21 = vld [vmem:[#allocation5 + $0xbd8] sm:$0xff]  ;;  %v438_v32 = vld [vmem:[#allocation5 + $0xbe0] sm:$0xff] }
  0xcb   :  { %v549_v48 = vcombine.high %v2469_v35, %v2469_v35  ;;  %v2187_v49 = vpack.c.bf16 %v381_v39, %v380_v42  ;;  %v439_v34 = vld [vmem:[#allocation5 + $0xbe8] sm:$0xff]  ;;  %v390_v42 = vld [vmem:[#allocation5 + $0xa60] sm:$0xff] }
  0xcc   :  { %2136 = vmatpush3.bf16.msra.mxu0 %v2135_v44  ;;  %v399_v44 = vld [vmem:[#allocation5 + $0xaa8] sm:$0xff] }
  0xcd   :  { %2168 = vmatpush3.bf16.msra.mxu1 %v2167_v46  ;;  %2138 = vmatprep.subr.bf16.mxu0 %v2137_v47  ;;  %v548_v46 = vcombine.high %v2466_v31, %v2466_v31  ;;  %v431_v47 = vld [vmem:[#allocation5 + $0xba8] sm:$0xff] }
  0xce   :  { %2170 = vmatprep.subr.bf16.mxu1 %v2169_v51  ;;  %v2189_v51 = vpack.c.bf16 %v399_v44, %v398_v52  ;;  %v2221_v57 = vpack.c.bf16 %v431_v47, %v430_v13  ;;  %v391_v39 = vld [vmem:[#allocation5 + $0xa68] sm:$0xff]  ;;  %v408_v52 = vld [vmem:[#allocation5 + $0xaf0] sm:$0xff]  ;;  %v409_v44 = vld [vmem:[#allocation5 + $0xaf8] sm:$0xff] }
  0xcf   :  { %v441_v13 = vld [vmem:[#allocation5 + $0xbf8] sm:$0xff]  ;;  %v2207_v47 = vpack.c.bf16 %v391_v39, %v390_v42  ;;  %v1440_v39 = vld [vmem:[#allocation7] ss:$0 sm:$0xff] }
  0xd0   :  { %2140 = vmatpush3.bf16.msra.mxu0 %v2139_v59  ;;  %v401_v59 = vld [vmem:[#allocation5 + $0xab8] sm:$0xff] }
  0xd1   :  { %2172 = vmatpush3.bf16.msra.mxu1 %v2171_v60  ;;  %2142 = vmatprep.subr.bf16.mxu0 %v2141_v61  ;;  %v432_v60 = vld [vmem:[#allocation5 + $0xbb0] sm:$0xff]  ;;  %v433_v61 = vld [vmem:[#allocation5 + $0xbb8] sm:$0xff] }
  0xd2   :  { %2174 = vmatprep.subr.bf16.mxu1 %v2173_v45  ;;  %v385_v45 = vld [vmem:[#allocation5 + $0xa38] sm:$0xff]  ;;  %v2225_v2 = vpack.c.bf16 %v433_v61, %v432_v60 }
  0xd4   :  { %2144 = vmatpush3.bf16.msra.mxu0 %v2143_v6  ;;  %v434_v6 = vld [vmem:[#allocation5 + $0xbc0] sm:$0xff] }
  0xd5   :  { %2176 = vmatpush3.bf16.msra.mxu1 %v2175_v8  ;;  %2146 = vmatprep.subr.bf16.mxu0 %v2145_v9  ;;  %v2195_v8 = vpack.c.bf16 %v385_v45, %v384_v0  ;;  %v2227_v9 = vpack.c.bf16 %v417_v3, %v416_v1  ;;  %v2229_v17 = vpack.c.bf16 %v435_v7, %v434_v6 }
  0xd6   :  { %2178 = vmatprep.subr.bf16.mxu1 %v2177_v16  ;;  %v418_v16 = vld [vmem:[#allocation5 + $0xb40] sm:$0xff] }
  0xd8   :  { %2148 = vmatpush3.bf16.msra.mxu0 %v2147_v15  ;;  %v2199_v15 = vpack.c.bf16 %v387_v14, %v386_v12 }
  0xd9   :  { %2180 = vmatpush3.bf16.msra.mxu1 %v2179_v22  ;;  %2182 = vmatprep.subr.bf16.mxu0 %v2181_v23  ;;  %v2231_v22 = vpack.c.bf16 %v419_v11, %v418_v16  ;;  %v2201_v23 = vpack.c.bf16 %v405_v19, %v404_v18 }
  0xda   :  { %2214 = vmatprep.subr.bf16.mxu1 %v2213_v27  ;;  %v2233_v27 = vpack.c.bf16 %v437_v21, %v436_v20 }
  0xdb   :  { %1199 = vmatmul.mubr.f32.vlgmr.msra.gmra.mrb[8].mxu0 %v2454_v55  ;;  %v400_v55 = vld [vmem:[#allocation5 + $0xab0] sm:$0xff] }
  0xdc   :  { %2184 = vmatpush3.bf16.msra.mxu0 %v2183_v36  ;;  %1269 = vmatmul.mubr.f32.vlgmr.msra.gmra.mrb[8].mxu1 %v2457_v58  ;;  %v2223_v58 = vpack.c.bf16 %v415_v33, %v414_v56  ;;  %v2193_v63 = vpack.c.bf16 %v401_v59, %v400_v55  ;;  %v2203_v36 = vpack.c.bf16 %v389_v25, %v388_v24  ;;  %v425_v56 = vld [vmem:[#allocation5 + $0xb78] sm:$0xff] }
  0xdd   :  { %2216 = vmatpush3.bf16.msra.mxu1 %v2215_v37  ;;  %2186 = vmatprep.subr.bf16.mxu0 %v2185_v38  ;;  %v2235_v37 = vpack.c.bf16 %v421_v28, %v420_v26  ;;  %v2205_v38 = vpack.c.bf16 %v407_v30, %v406_v29  ;;  %v2243_v33 = vpack.c.bf16 %v425_v56, %v424_v54 }
  0xde   :  { %2218 = vmatprep.subr.bf16.mxu1 %v2217_v41  ;;  %1338 = vmatprep.mubr.f32.mxu0 %v548_v46  ;;  %v2237_v41 = vpack.c.bf16 %v439_v34, %v438_v32  ;;  %v440_v46 = vld [vmem:[#allocation5 + $0xbf0] sm:$0xff] }
  0xdf   :  { %1408 = vmatprep.mubr.f32.mxu1 %v549_v48  ;;  %v2239_v48 = vpack.c.bf16 %v423_v43, %v422_v40  ;;  %v2241_v53 = vpack.c.bf16 %v441_v13, %v440_v46 }
  0xe0   :  { %2188 = vmatpush3.bf16.msra.mxu0 %v2187_v49  ;;  %v2209_v49 = vpack.c.bf16 %v409_v44, %v408_v52 }
  0xe1   :  { %2220 = vmatpush3.bf16.msra.mxu1 %v2219_v50  ;;  %2190 = vmatprep.subr.bf16.mxu0 %v2189_v51  ;;  %v392_v50 = vld [vmem:[#allocation5 + $0xa70] sm:$0xff]  ;;  %v393_v51 = vld [vmem:[#allocation5 + $0xa78] sm:$0xff] }
  0xe2   :  { %2222 = vmatprep.subr.bf16.mxu1 %v2221_v57  ;;  %v2211_v57 = vpack.c.bf16 %v393_v51, %v392_v50 }
  0xe4   :  { %2192 = vmatpush3.bf16.msra.mxu0 %v2191_v62 }
  0xe5   :  { %2224 = vmatpush3.bf16.msra.mxu1 %v2223_v58  ;;  %2194 = vmatprep.subr.bf16.mxu0 %v2193_v63 }
  0xe6   :  { %2226 = vmatprep.subr.bf16.mxu1 %v2225_v2 }
  0xe8   :  { %2196 = vmatpush3.bf16.msra.mxu0 %v2195_v8 }
  0xe9   :  { %2228 = vmatpush3.bf16.msra.mxu1 %v2227_v9  ;;  %2198 = vmatprep.subr.bf16.mxu0 %v2197_v10 }
  0xea   :  { %2230 = vmatprep.subr.bf16.mxu1 %v2229_v17 }
  0xec   :  { %2200 = vmatpush3.bf16.msra.mxu0 %v2199_v15 }
  0xed   :  { %2232 = vmatpush3.bf16.msra.mxu1 %v2231_v22  ;;  %2202 = vmatprep.subr.bf16.mxu0 %v2201_v23 }
  0xee   :  { %2234 = vmatprep.subr.bf16.mxu1 %v2233_v27 }
  0xf0   :  { %2204 = vmatpush3.bf16.msra.mxu0 %v2203_v36 }
  0xf1   :  { %2236 = vmatpush3.bf16.msra.mxu1 %v2235_v37  ;;  %2206 = vmatprep.subr.bf16.mxu0 %v2205_v38 }
  0xf2   :  { %2238 = vmatprep.subr.bf16.mxu1 %v2237_v41 }
  0xf4   :  { %2208 = vmatpush3.bf16.msra.mxu0 %v2207_v47 }
  0xf5   :  { %2240 = vmatpush3.bf16.msra.mxu1 %v2239_v48  ;;  %2210 = vmatprep.subr.bf16.mxu0 %v2209_v49 }
  0xf6   :  { %2242 = vmatprep.subr.bf16.mxu1 %v2241_v53 }
  0xf8   :  { %2212 = vmatpush3.bf16.msra.mxu0 %v2211_v57 }
  0xf9   :  { %2244 = vmatpush3.bf16.msra.mxu1 %v2243_v33 }
  0xfb   :  { %1339 = vmatmul.mubr.f32.vlgmr.msra.gmra.mrb[10].mxu0 %v2466_v31 }
  0xfc   :  { %1409 = vmatmul.mubr.f32.vlgmr.msra.gmra.mrb[10].mxu1 %v2469_v35 }
 0x12e   :  { %v1473_v55 = vpop.f32.mrb[0].mxu0 }
 0x12f   :  { %v1508_v59 = vpop.f32.mrb[0].mxu1  ;;  %v1474_v60 = vpop.f32.mrb[1].mxu0 }
 0x130   :  { %v1475_v61 = vadd.f32 %v1474_v60, %v1473_v55  ;;  %v1509_v62 = vpop.f32.mrb[1].mxu1 }
 0x131   :  { %v1510_v58 = vadd.f32 %v1509_v62, %v1508_v59 }
 0x133   :  { %v711_v63 = vadd.f32 %v1510_v58, %v1475_v61 }
 0x14e   :  { %v1543_v0 = vpop.f32.mrb[2].mxu0 }
 0x14f   :  { %v1544_v45 = vpop.f32.mrb[3].mxu0  ;;  %v1578_v1 = vpop.f32.mrb[2].mxu1 }
 0x150   :  { %v1545_v2 = vadd.f32 %v1544_v45, %v1543_v0  ;;  %v1579_v3 = vpop.f32.mrb[3].mxu1 }
 0x151   :  { %v1580_v4 = vadd.f32 %v1579_v3, %v1578_v1 }
 0x152   :  { %v781_v5 = vadd.f32 %v1545_v2, %v711_v63 }
 0x154   :  { %v851_v6 = vadd.f32 %v1580_v4, %v781_v5 }
 0x16e   :  { %v1613_v7 = vpop.f32.mrb[4].mxu0 }
 0x16f   :  { %v1614_v8 = vpop.f32.mrb[5].mxu0  ;;  %v1648_v31 = vpop.f32.mrb[4].mxu1 }
 0x170   :  { %v1615_v9 = vadd.f32 %v1614_v8, %v1613_v7  ;;  %v1649_v35 = vpop.f32.mrb[5].mxu1 }
 0x171   :  { %v1650_v10 = vadd.f32 %v1649_v35, %v1648_v31 }
 0x172   :  { %v921_v12 = vadd.f32 %v1615_v9, %v851_v6 }
 0x174   :  { %v991_v14 = vadd.f32 %v1650_v10, %v921_v12 }
 0x18e   :  { %v1683_v16 = vpop.f32.mrb[6].mxu0 }
 0x18f   :  { %v1684_v17 = vpop.f32.mrb[7].mxu0  ;;  %v1718_v11 = vpop.f32.mrb[6].mxu1 }
 0x190   :  { %v1685_v18 = vadd.f32 %v1684_v17, %v1683_v16  ;;  %v1719_v19 = vpop.f32.mrb[7].mxu1 }
 0x191   :  { %v1720_v20 = vadd.f32 %v1719_v19, %v1718_v11 }
 0x192   :  { %v1061_v21 = vadd.f32 %v1685_v18, %v991_v14 }
 0x194   :  { %v1131_v15 = vadd.f32 %v1720_v20, %v1061_v21 }
 0x1ae   :  { %v1753_v22 = vpop.f32.mrb[8].mxu0 }
 0x1af   :  { %v1754_v23 = vpop.f32.mrb[9].mxu0  ;;  %v1788_v24 = vpop.f32.mrb[8].mxu1 }
 0x1b0   :  { %v1755_v25 = vadd.f32 %v1754_v23, %v1753_v22  ;;  %v1789_v26 = vpop.f32.mrb[9].mxu1 }
 0x1b1   :  { %v1790_v27 = vadd.f32 %v1789_v26, %v1788_v24 }
 0x1b2   :  { %v1201_v28 = vadd.f32 %v1755_v25, %v1131_v15 }
 0x1b4   :  { %v1271_v29 = vadd.f32 %v1790_v27, %v1201_v28 }
 0x1ce   :  { %v1823_v30 = vpop.f32.mrb[10].mxu0 }
 0x1cf   :  { %v1824_v32 = vpop.f32.mrb[11].mxu0  ;;  %v1858_v34 = vpop.f32.mrb[10].mxu1 }
 0x1d0   :  { %v1825_v36 = vadd.f32 %v1824_v32, %v1823_v30  ;;  %v1859_v37 = vpop.f32.mrb[11].mxu1 }
 0x1d1   :  { %v1860_v38 = vadd.f32 %v1859_v37, %v1858_v34 }
 0x1d2   :  { %v1341_v42 = vadd.f32 %v1825_v36, %v1271_v29 }
 0x1d4   :  { %v1411_v40 = vadd.f32 %v1860_v38, %v1341_v42 }
 0x1d6   :  { %v1421_v41 = vadd.f32 %v1440_v39, %v1411_v40 }
 0x1d8   :  { %1423 = vst.msk [vmem:[#allocation8] sm:$0x3] %vm1422_vm0, %v1421_v41 }
 0x1d9   :  { %2335 = shalt.err (!%p2332_p0)
}
 0x1da   :  { %s2336_s26 = scalar_lea.hbm %s2494_s3, 32 }
 0x1db   :  { %p2337_p1 = scmp.ne.s32.totalorder %s2494_s3, %s2336_s26  ;;  %p2340_p2 = scmp.lt.u32.totalorder %s2336_s26, %s2494_s3 }
 0x1dd   :  { %p2342_p3 = pnand %p2340_p2, %p2337_p1 }
 0x1df   :  { %2345 = shalt.err (!%p2342_p3)
}
 0x1e0   :  { %1433 = dma.vmem_to_hbm [thread:$0]  %s1431_s22, 32, %s2494_s3, [#allocation4]  }
 0x1e1   :  { %2350 = dma.done.wait [#allocation4], 32  }
 0x1e2   :  { %2351 = vsyncadd [#allocation4], 4294967264 }
 0x1e3   :  { %1437 = vsyncpa [#allocation3], 1 }
 0x1e4   :  { %1438 = vsyncpa [#allocation6], 1 }
 0x1e5   :  { %1439 = vsyncpa [#allocation4], 1 }

</bundles_post_ra>
